<compile_context>
chip_gen: v5e
topology: v5e:2x2
jax: 0.10.0
libtpu: 0.0.40
codegen_flags: <defaults>
</compile_context>

<pallas_src>
import jax
import jax.numpy as jnp
from jax import lax
from jax.experimental import pallas as pl
from jax.experimental.pallas import tpu as pltpu


def _round_up(x, m):
    return ((x + m - 1) // m) * m


def smileslm_kernel(smiles_ref, table_ref, w_ref, b_ref,
                    logits_ref, mean_ref, counts_acc):
    """Fused embedding-gather (as vocab counts) + masked mean pool + linear head.

    smiles_ref : (BT, ST)        int32   token ids (0 == padding)
    table_ref  : (V_pad, D_pad)  float32 embedding table, row 0 zeroed (resident)
    w_ref      : (D_pad, O_pad)  float32 head weight, pre-transposed (resident)
    b_ref      : (1, O_pad)      float32 head bias (resident)
    logits_ref : (BT, O_pad)     float32 output 0
    mean_ref   : (BT, D_pad)     float32 output 1 (mean embeddings)
    counts_acc : (BT, V_pad)     float32 scratch: running per-vocab token counts
    """
    k = pl.program_id(1)

    @pl.when(k == 0)
    def _init():
        counts_acc[...] = jnp.zeros_like(counts_acc)

    ids = smiles_ref[...]                                  # (BT, ST) int32
    bt, st = ids.shape
    v = counts_acc.shape[1]

    # Per-vocab occurrence counts for this tile, built one sequence position at
    # a time so the live working set is just two (BT, V_pad) tiles (no 3D
    # one-hot intermediate, no vreg spills). All slices are static; the add
    # chain keeps live ranges bounded.
    lane_vocab = lax.broadcasted_iota(jnp.int32, (bt, v), 1)   # lane iota
    tile_counts = jnp.zeros((bt, v), jnp.float32)
    for s in range(st):
        col = ids[:, s:s + 1]                              # (BT, 1) static slice
        tile_counts = tile_counts + (col == lane_vocab).astype(jnp.float32)
    counts_acc[...] += tile_counts

    @pl.when(k == pl.num_programs(1) - 1)
    def _finalize():
        counts = counts_acc[...]
        # Single table matmul per batch tile (hoisted out of the sequence
        # loop). Table row 0 is zeroed, so padding (id 0) contributes nothing.
        summed = jnp.dot(counts, table_ref[...],
                         preferred_element_type=jnp.float32)   # (BT, D_pad)
        # Valid-token count = every counted token except the padding column 0.
        col_ids = lax.broadcasted_iota(jnp.int32, counts.shape, 1)
        denom = jnp.sum(jnp.where(col_ids > 0, counts, 0.0),
                        axis=-1, keepdims=True)                # (BT, 1)
        # Clamp: an all-padding row yields 0 instead of the reference's NaN/Inf.
        denom = jnp.maximum(denom, 1.0)
        mean = summed * pl.reciprocal(denom, approx=False)
        mean_ref[...] = mean
        # Head matmul + bias, once per batch tile.
        logits_ref[...] = (
            jnp.dot(mean, w_ref[...], preferred_element_type=jnp.float32)
            + b_ref[...]
        )


def smileslm_forward(smiles, embed_table, w_head, b_head, *,
                     block_b=128, block_s=512):
    """Pad to lane/sublane-aligned shapes, run the Pallas kernel, slice back."""
    B, S = smiles.shape
    VOCAB, D = embed_table.shape
    OUT = w_head.shape[0]

    # Tile sizes: as large as the padded problem allows, capped at block_b /
    # block_s. BT=128 fills the MXU M dim on v5e (use block_b=256 on v6e/v7x
    # if VMEM allows); ST covers all of S when S is small.
    BT = min(block_b, _round_up(B, 8))
    ST = min(block_s, _round_up(S, 128))
    B_pad = _round_up(B, BT)
    S_pad = _round_up(S, ST)
    D_pad = _round_up(D, 128)
    O_pad = _round_up(OUT, 128)
    V_pad = _round_up(VOCAB, 128)

    # Zero padding: padded sequence slots get token id 0 (excluded from the
    # denominator and hitting the zeroed table row), padded table rows/cols,
    # weight rows and logit columns are zero, so the math is unchanged.
    smiles_p = jnp.zeros((B_pad, S_pad), jnp.int32).at[:B, :S].set(
        smiles.astype(jnp.int32))
    table_p = jnp.zeros((V_pad, D_pad), jnp.float32).at[:VOCAB, :D].set(
        embed_table.astype(jnp.float32))
    # Token id 0 is padding: zero its embedding row so unmasked counts can be
    # used directly (replaces the per-element 3D mask inside the kernel).
    table_p = table_p.at[0, :].set(0.0)
    w_t_p = jnp.zeros((D_pad, O_pad), jnp.float32).at[:D, :OUT].set(
        jnp.transpose(w_head).astype(jnp.float32))
    b_p = jnp.zeros((1, O_pad), jnp.float32).at[0, :OUT].set(
        b_head.astype(jnp.float32))

    grid = (B_pad // BT, S_pad // ST)

    def _resident(shape):
        # Constant-index operands: fetched once, single-buffered to halve
        # their VMEM footprint (matters once VOCAB/D grow).
        return pl.BlockSpec(shape, lambda i, k: (0, 0),
                            pipeline_mode=pl.Buffered(1))

    logits_p, mean_p = pl.pallas_call(
        smileslm_kernel,
        out_shape=(
            jax.ShapeDtypeStruct((B_pad, O_pad), jnp.float32),
            jax.ShapeDtypeStruct((B_pad, D_pad), jnp.float32),
        ),
        grid_spec=pltpu.PrefetchScalarGridSpec(
            num_scalar_prefetch=0,
            grid=grid,
            in_specs=[
                pl.BlockSpec((BT, ST), lambda i, k: (i, k)),    # token ids
                _resident((V_pad, D_pad)),                      # embedding table
                _resident((D_pad, O_pad)),                      # W^T
                _resident((1, O_pad)),                          # bias
            ],
            out_specs=(
                pl.BlockSpec((BT, O_pad), lambda i, k: (i, 0)),  # logits
                pl.BlockSpec((BT, D_pad), lambda i, k: (i, 0)),  # mean embeddings
            ),
            scratch_shapes=[
                pltpu.VMEM((BT, V_pad), jnp.float32),            # vocab-count acc
            ],
        ),
        compiler_params=pltpu.CompilerParams(
            # Batch axis parallel (the 2nd TC on v7x only pays off once
            # B_pad//BT >= 2); sequence axis is the reduction.
            dimension_semantics=("parallel", "arbitrary"),
            # Safe on all generations (v7x: keep well under 64 MiB/TC; on v6e
            # this can be raised toward 64-100 MiB for larger tiles/tables).
            vmem_limit_bytes=32 * 1024 * 1024,
        ),
    )(smiles_p, table_p, w_t_p, b_p)

    return logits_p[:B, :OUT], mean_p[:B, :D]


if __name__ == "__main__":
    # Small shapes consistent with the module's forward.
    B, S = 2, 8          # batch, sequence length
    VOCAB = 20
    D_MODEL = 32         # bert.d_model
    OUTPUT = 4           # PropertiesPrediction output size

    key = jax.random.PRNGKey(0)
    k_tok, k_emb, k_w, k_b = jax.random.split(key, 4)

    # Token ids with some padding (id 0 is padding -> excluded by mask).
    smiles = jax.random.randint(k_tok, (B, S), 0, VOCAB, dtype=jnp.int32)
    # Guarantee at least one valid (non-zero) token per row.
    smiles = smiles.at[:, 0].set(1)

    # Deterministic parameters (synthetic; no checkpoint load).
    embed_table = jax.random.normal(k_emb, (VOCAB, D_MODEL), dtype=jnp.float32) * 0.02
    w_head = jax.random.normal(k_w, (OUTPUT, D_MODEL), dtype=jnp.float32) * 0.1
    b_head = jax.random.normal(k_b, (OUTPUT,), dtype=jnp.float32) * 0.1

    logits, mean_emb = smileslm_forward(smiles, embed_table, w_head, b_head)
    jax.block_until_ready((logits, mean_emb))

    # Reference check in plain JAX (same math as the PyTorch forward, eval mode).
    emb_ref = jnp.take(embed_table, smiles, axis=0)
    mask = (smiles > 0).astype(jnp.float32)[..., None]
    mean_ref = (emb_ref * mask).sum(axis=1) / mask.sum(axis=1)
    logits_ref = mean_ref @ w_head.T + b_head

    assert jnp.allclose(mean_emb, mean_ref, atol=1e-5, rtol=1e-4), "mean mismatch"
    assert jnp.allclose(logits, logits_ref, atol=1e-5, rtol=1e-4), "logits mismatch"

    print("KERNEL_OK")
</pallas_src>

<mosaic_0001>
module attributes {stable_mosaic.version = 11 : i64} {
  func.func @smileslm_kernel(%arg0: i32, %arg1: i32, %arg2: memref<8x128xi32, #tpu.memory_space<vmem>>, %arg3: memref<128x128xf32, #tpu.memory_space<vmem>>, %arg4: memref<128x128xf32, #tpu.memory_space<vmem>>, %arg5: memref<1x128xf32, #tpu.memory_space<vmem>>, %arg6: memref<8x128xf32, #tpu.memory_space<vmem>>, %arg7: memref<8x128xf32, #tpu.memory_space<vmem>>, %arg8: memref<8x128xf32, #tpu.memory_space<vmem>>) attributes {dimension_semantics = [#tpu.dimension_semantics<parallel>, #tpu.dimension_semantics<arbitrary>], iteration_bounds = array<i64: 1, 1>, scalar_prefetch = 0 : i64, scratch_operands = 1 : i64, tpu.core_type = #tpu.core_type<tc>, window_params = [{transform_indices = @transform_0, window_bounds = array<i64: 8, 128>}, {pipeline_mode = #tpu.pipeline_mode<synchronous>, transform_indices = @transform_1, window_bounds = array<i64: 128, 128>}, {pipeline_mode = #tpu.pipeline_mode<synchronous>, transform_indices = @transform_2, window_bounds = array<i64: 128, 128>}, {pipeline_mode = #tpu.pipeline_mode<synchronous>, transform_indices = @transform_3, window_bounds = array<i64: 1, 128>}, {transform_indices = @transform_4, window_bounds = array<i64: 8, 128>}, {transform_indices = @transform_5, window_bounds = array<i64: 8, 128>}]} {
    %c0_i32 = arith.constant 0 : i32
    %0 = arith.cmpi eq, %arg1, %c0_i32 : i32
    %1 = arith.extui %0 : i1 to i32
    %c0_i32_0 = arith.constant 0 : i32
    %2 = arith.cmpi ne, %1, %c0_i32_0 : i32
    scf.if %2 {
      %cst_8 = arith.constant 0.000000e+00 : f32
      %780 = vector.broadcast %cst_8 : f32 to vector<8x128xf32>
      %c0_9 = arith.constant 0 : index
      %c0_10 = arith.constant 0 : index
      %781 = vector.load %arg8[%c0_9, %c0_10] : memref<8x128xf32, #tpu.memory_space<vmem>>, vector<8x128xf32>
      tpu.vector_store %arg8[%c0_9, %c0_10], %780 {strides = array<i32>} : memref<8x128xf32, #tpu.memory_space<vmem>>, vector<8x128xf32>,
    } else {
    }
    %c0 = arith.constant 0 : index
    %c0_1 = arith.constant 0 : index
    %3 = vector.load %arg2[%c0, %c0_1] : memref<8x128xi32, #tpu.memory_space<vmem>>, vector<8x128xi32>
    %4 = tpu.iota {dimensions = array<i32: 1>} : vector<8x128xi32>
    %cst = arith.constant 0.000000e+00 : f32
    %5 = vector.broadcast %cst : f32 to vector<8x128xf32>
    %6 = vector.extract_strided_slice %3 {offsets = [0, 0], sizes = [8, 1], strides = [1, 1]} : vector<8x128xi32> to vector<8x1xi32>
    %7 = vector.broadcast %6 : vector<8x1xi32> to vector<8x128xi32>
    %8 = arith.cmpi eq, %7, %4 : vector<8x128xi32>
    %9 = arith.extui %8 : vector<8x128xi1> to vector<8x128xi32>
    %10 = arith.sitofp %9 : vector<8x128xi32> to vector<8x128xf32>
    %11 = arith.addf %5, %10 : vector<8x128xf32>
    %12 = vector.extract_strided_slice %3 {offsets = [0, 1], sizes = [8, 1], strides = [1, 1]} : vector<8x128xi32> to vector<8x1xi32>
    %13 = vector.broadcast %12 : vector<8x1xi32> to vector<8x128xi32>
    %14 = arith.cmpi eq, %13, %4 : vector<8x128xi32>
    %15 = arith.extui %14 : vector<8x128xi1> to vector<8x128xi32>
    %16 = arith.sitofp %15 : vector<8x128xi32> to vector<8x128xf32>
    %17 = arith.addf %11, %16 : vector<8x128xf32>
    %18 = vector.extract_strided_slice %3 {offsets = [0, 2], sizes = [8, 1], strides = [1, 1]} : vector<8x128xi32> to vector<8x1xi32>
    %19 = vector.broadcast %18 : vector<8x1xi32> to vector<8x128xi32>
    %20 = arith.cmpi eq, %19, %4 : vector<8x128xi32>
    %21 = arith.extui %20 : vector<8x128xi1> to vector<8x128xi32>
    %22 = arith.sitofp %21 : vector<8x128xi32> to vector<8x128xf32>
    %23 = arith.addf %17, %22 : vector<8x128xf32>
    %24 = vector.extract_strided_slice %3 {offsets = [0, 3], sizes = [8, 1], strides = [1, 1]} : vector<8x128xi32> to vector<8x1xi32>
    %25 = vector.broadcast %24 : vector<8x1xi32> to vector<8x128xi32>
    %26 = arith.cmpi eq, %25, %4 : vector<8x128xi32>
    %27 = arith.extui %26 : vector<8x128xi1> to vector<8x128xi32>
    %28 = arith.sitofp %27 : vector<8x128xi32> to vector<8x128xf32>
    %29 = arith.addf %23, %28 : vector<8x128xf32>
    %30 = vector.extract_strided_slice %3 {offsets = [0, 4], sizes = [8, 1], strides = [1, 1]} : vector<8x128xi32> to vector<8x1xi32>
    %31 = vector.broadcast %30 : vector<8x1xi32> to vector<8x128xi32>
    %32 = arith.cmpi eq, %31, %4 : vector<8x128xi32>
    %33 = arith.extui %32 : vector<8x128xi1> to vector<8x128xi32>
    %34 = arith.sitofp %33 : vector<8x128xi32> to vector<8x128xf32>
    %35 = arith.addf %29, %34 : vector<8x128xf32>
    %36 = vector.extract_strided_slice %3 {offsets = [0, 5], sizes = [8, 1], strides = [1, 1]} : vector<8x128xi32> to vector<8x1xi32>
    %37 = vector.broadcast %36 : vector<8x1xi32> to vector<8x128xi32>
    %38 = arith.cmpi eq, %37, %4 : vector<8x128xi32>
    %39 = arith.extui %38 : vector<8x128xi1> to vector<8x128xi32>
    %40 = arith.sitofp %39 : vector<8x128xi32> to vector<8x128xf32>
    %41 = arith.addf %35, %40 : vector<8x128xf32>
    %42 = vector.extract_strided_slice %3 {offsets = [0, 6], sizes = [8, 1], strides = [1, 1]} : vector<8x128xi32> to vector<8x1xi32>
    %43 = vector.broadcast %42 : vector<8x1xi32> to vector<8x128xi32>
    %44 = arith.cmpi eq, %43, %4 : vector<8x128xi32>
    %45 = arith.extui %44 : vector<8x128xi1> to vector<8x128xi32>
    %46 = arith.sitofp %45 : vector<8x128xi32> to vector<8x128xf32>
    %47 = arith.addf %41, %46 : vector<8x128xf32>
    %48 = vector.extract_strided_slice %3 {offsets = [0, 7], sizes = [8, 1], strides = [1, 1]} : vector<8x128xi32> to vector<8x1xi32>
    %49 = vector.broadcast %48 : vector<8x1xi32> to vector<8x128xi32>
    %50 = arith.cmpi eq, %49, %4 : vector<8x128xi32>
    %51 = arith.extui %50 : vector<8x128xi1> to vector<8x128xi32>
    %52 = arith.sitofp %51 : vector<8x128xi32> to vector<8x128xf32>
    %53 = arith.addf %47, %52 : vector<8x128xf32>
    %54 = vector.extract_strided_slice %3 {offsets = [0, 8], sizes = [8, 1], strides = [1, 1]} : vector<8x128xi32> to vector<8x1xi32>
    %55 = vector.broadcast %54 : vector<8x1xi32> to vector<8x128xi32>
    %56 = arith.cmpi eq, %55, %4 : vector<8x128xi32>
    %57 = arith.extui %56 : vector<8x128xi1> to vector<8x128xi32>
    %58 = arith.sitofp %57 : vector<8x128xi32> to vector<8x128xf32>
    %59 = arith.addf %53, %58 : vector<8x128xf32>
    %60 = vector.extract_strided_slice %3 {offsets = [0, 9], sizes = [8, 1], strides = [1, 1]} : vector<8x128xi32> to vector<8x1xi32>
    %61 = vector.broadcast %60 : vector<8x1xi32> to vector<8x128xi32>
    %62 = arith.cmpi eq, %61, %4 : vector<8x128xi32>
    %63 = arith.extui %62 : vector<8x128xi1> to vector<8x128xi32>
    %64 = arith.sitofp %63 : vector<8x128xi32> to vector<8x128xf32>
    %65 = arith.addf %59, %64 : vector<8x128xf32>
    %66 = vector.extract_strided_slice %3 {offsets = [0, 10], sizes = [8, 1], strides = [1, 1]} : vector<8x128xi32> to vector<8x1xi32>
    %67 = vector.broadcast %66 : vector<8x1xi32> to vector<8x128xi32>
    %68 = arith.cmpi eq, %67, %4 : vector<8x128xi32>
    %69 = arith.extui %68 : vector<8x128xi1> to vector<8x128xi32>
    %70 = arith.sitofp %69 : vector<8x128xi32> to vector<8x128xf32>
    %71 = arith.addf %65, %70 : vector<8x128xf32>
    %72 = vector.extract_strided_slice %3 {offsets = [0, 11], sizes = [8, 1], strides = [1, 1]} : vector<8x128xi32> to vector<8x1xi32>
    %73 = vector.broadcast %72 : vector<8x1xi32> to vector<8x128xi32>
    %74 = arith.cmpi eq, %73, %4 : vector<8x128xi32>
    %75 = arith.extui %74 : vector<8x128xi1> to vector<8x128xi32>
    %76 = arith.sitofp %75 : vector<8x128xi32> to vector<8x128xf32>
    %77 = arith.addf %71, %76 : vector<8x128xf32>
    %78 = vector.extract_strided_slice %3 {offsets = [0, 12], sizes = [8, 1], strides = [1, 1]} : vector<8x128xi32> to vector<8x1xi32>
    %79 = vector.broadcast %78 : vector<8x1xi32> to vector<8x128xi32>
    %80 = arith.cmpi eq, %79, %4 : vector<8x128xi32>
    %81 = arith.extui %80 : vector<8x128xi1> to vector<8x128xi32>
    %82 = arith.sitofp %81 : vector<8x128xi32> to vector<8x128xf32>
    %83 = arith.addf %77, %82 : vector<8x128xf32>
    %84 = vector.extract_strided_slice %3 {offsets = [0, 13], sizes = [8, 1], strides = [1, 1]} : vector<8x128xi32> to vector<8x1xi32>
    %85 = vector.broadcast %84 : vector<8x1xi32> to vector<8x128xi32>
    %86 = arith.cmpi eq, %85, %4 : vector<8x128xi32>
    %87 = arith.extui %86 : vector<8x128xi1> to vector<8x128xi32>
    %88 = arith.sitofp %87 : vector<8x128xi32> to vector<8x128xf32>
    %89 = arith.addf %83, %88 : vector<8x128xf32>
    %90 = vector.extract_strided_slice %3 {offsets = [0, 14], sizes = [8, 1], strides = [1, 1]} : vector<8x128xi32> to vector<8x1xi32>
    %91 = vector.broadcast %90 : vector<8x1xi32> to vector<8x128xi32>
    %92 = arith.cmpi eq, %91, %4 : vector<8x128xi32>
    %93 = arith.extui %92 : vector<8x128xi1> to vector<8x128xi32>
    %94 = arith.sitofp %93 : vector<8x128xi32> to vector<8x128xf32>
    %95 = arith.addf %89, %94 : vector<8x128xf32>
    %96 = vector.extract_strided_slice %3 {offsets = [0, 15], sizes = [8, 1], strides = [1, 1]} : vector<8x128xi32> to vector<8x1xi32>
    %97 = vector.broadcast %96 : vector<8x1xi32> to vector<8x128xi32>
    %98 = arith.cmpi eq, %97, %4 : vector<8x128xi32>
    %99 = arith.extui %98 : vector<8x128xi1> to vector<8x128xi32>
    %100 = arith.sitofp %99 : vector<8x128xi32> to vector<8x128xf32>
    %101 = arith.addf %95, %100 : vector<8x128xf32>
    %102 = vector.extract_strided_slice %3 {offsets = [0, 16], sizes = [8, 1], strides = [1, 1]} : vector<8x128xi32> to vector<8x1xi32>
    %103 = vector.broadcast %102 : vector<8x1xi32> to vector<8x128xi32>
    %104 = arith.cmpi eq, %103, %4 : vector<8x128xi32>
    %105 = arith.extui %104 : vector<8x128xi1> to vector<8x128xi32>
    %106 = arith.sitofp %105 : vector<8x128xi32> to vector<8x128xf32>
    %107 = arith.addf %101, %106 : vector<8x128xf32>
    %108 = vector.extract_strided_slice %3 {offsets = [0, 17], sizes = [8, 1], strides = [1, 1]} : vector<8x128xi32> to vector<8x1xi32>
    %109 = vector.broadcast %108 : vector<8x1xi32> to vector<8x128xi32>
    %110 = arith.cmpi eq, %109, %4 : vector<8x128xi32>
    %111 = arith.extui %110 : vector<8x128xi1> to vector<8x128xi32>
    %112 = arith.sitofp %111 : vector<8x128xi32> to vector<8x128xf32>
    %113 = arith.addf %107, %112 : vector<8x128xf32>
    %114 = vector.extract_strided_slice %3 {offsets = [0, 18], sizes = [8, 1], strides = [1, 1]} : vector<8x128xi32> to vector<8x1xi32>
    %115 = vector.broadcast %114 : vector<8x1xi32> to vector<8x128xi32>
    %116 = arith.cmpi eq, %115, %4 : vector<8x128xi32>
    %117 = arith.extui %116 : vector<8x128xi1> to vector<8x128xi32>
    %118 = arith.sitofp %117 : vector<8x128xi32> to vector<8x128xf32>
    %119 = arith.addf %113, %118 : vector<8x128xf32>
    %120 = vector.extract_strided_slice %3 {offsets = [0, 19], sizes = [8, 1], strides = [1, 1]} : vector<8x128xi32> to vector<8x1xi32>
    %121 = vector.broadcast %120 : vector<8x1xi32> to vector<8x128xi32>
    %122 = arith.cmpi eq, %121, %4 : vector<8x128xi32>
    %123 = arith.extui %122 : vector<8x128xi1> to vector<8x128xi32>
    %124 = arith.sitofp %123 : vector<8x128xi32> to vector<8x128xf32>
    %125 = arith.addf %119, %124 : vector<8x128xf32>
    %126 = vector.extract_strided_slice %3 {offsets = [0, 20], sizes = [8, 1], strides = [1, 1]} : vector<8x128xi32> to vector<8x1xi32>
    %127 = vector.broadcast %126 : vector<8x1xi32> to vector<8x128xi32>
    %128 = arith.cmpi eq, %127, %4 : vector<8x128xi32>
    %129 = arith.extui %128 : vector<8x128xi1> to vector<8x128xi32>
    %130 = arith.sitofp %129 : vector<8x128xi32> to vector<8x128xf32>
    %131 = arith.addf %125, %130 : vector<8x128xf32>
    %132 = vector.extract_strided_slice %3 {offsets = [0, 21], sizes = [8, 1], strides = [1, 1]} : vector<8x128xi32> to vector<8x1xi32>
    %133 = vector.broadcast %132 : vector<8x1xi32> to vector<8x128xi32>
    %134 = arith.cmpi eq, %133, %4 : vector<8x128xi32>
    %135 = arith.extui %134 : vector<8x128xi1> to vector<8x128xi32>
    %136 = arith.sitofp %135 : vector<8x128xi32> to vector<8x128xf32>
    %137 = arith.addf %131, %136 : vector<8x128xf32>
    %138 = vector.extract_strided_slice %3 {offsets = [0, 22], sizes = [8, 1], strides = [1, 1]} : vector<8x128xi32> to vector<8x1xi32>
    %139 = vector.broadcast %138 : vector<8x1xi32> to vector<8x128xi32>
    %140 = arith.cmpi eq, %139, %4 : vector<8x128xi32>
    %141 = arith.extui %140 : vector<8x128xi1> to vector<8x128xi32>
    %142 = arith.sitofp %141 : vector<8x128xi32> to vector<8x128xf32>
    %143 = arith.addf %137, %142 : vector<8x128xf32>
    %144 = vector.extract_strided_slice %3 {offsets = [0, 23], sizes = [8, 1], strides = [1, 1]} : vector<8x128xi32> to vector<8x1xi32>
    %145 = vector.broadcast %144 : vector<8x1xi32> to vector<8x128xi32>
    %146 = arith.cmpi eq, %145, %4 : vector<8x128xi32>
    %147 = arith.extui %146 : vector<8x128xi1> to vector<8x128xi32>
    %148 = arith.sitofp %147 : vector<8x128xi32> to vector<8x128xf32>
    %149 = arith.addf %143, %148 : vector<8x128xf32>
    %150 = vector.extract_strided_slice %3 {offsets = [0, 24], sizes = [8, 1], strides = [1, 1]} : vector<8x128xi32> to vector<8x1xi32>
    %151 = vector.broadcast %150 : vector<8x1xi32> to vector<8x128xi32>
    %152 = arith.cmpi eq, %151, %4 : vector<8x128xi32>
    %153 = arith.extui %152 : vector<8x128xi1> to vector<8x128xi32>
    %154 = arith.sitofp %153 : vector<8x128xi32> to vector<8x128xf32>
    %155 = arith.addf %149, %154 : vector<8x128xf32>
    %156 = vector.extract_strided_slice %3 {offsets = [0, 25], sizes = [8, 1], strides = [1, 1]} : vector<8x128xi32> to vector<8x1xi32>
    %157 = vector.broadcast %156 : vector<8x1xi32> to vector<8x128xi32>
    %158 = arith.cmpi eq, %157, %4 : vector<8x128xi32>
    %159 = arith.extui %158 : vector<8x128xi1> to vector<8x128xi32>
    %160 = arith.sitofp %159 : vector<8x128xi32> to vector<8x128xf32>
    %161 = arith.addf %155, %160 : vector<8x128xf32>
    %162 = vector.extract_strided_slice %3 {offsets = [0, 26], sizes = [8, 1], strides = [1, 1]} : vector<8x128xi32> to vector<8x1xi32>
    %163 = vector.broadcast %162 : vector<8x1xi32> to vector<8x128xi32>
    %164 = arith.cmpi eq, %163, %4 : vector<8x128xi32>
    %165 = arith.extui %164 : vector<8x128xi1> to vector<8x128xi32>
    %166 = arith.sitofp %165 : vector<8x128xi32> to vector<8x128xf32>
    %167 = arith.addf %161, %166 : vector<8x128xf32>
    %168 = vector.extract_strided_slice %3 {offsets = [0, 27], sizes = [8, 1], strides = [1, 1]} : vector<8x128xi32> to vector<8x1xi32>
    %169 = vector.broadcast %168 : vector<8x1xi32> to vector<8x128xi32>
    %170 = arith.cmpi eq, %169, %4 : vector<8x128xi32>
    %171 = arith.extui %170 : vector<8x128xi1> to vector<8x128xi32>
    %172 = arith.sitofp %171 : vector<8x128xi32> to vector<8x128xf32>
    %173 = arith.addf %167, %172 : vector<8x128xf32>
    %174 = vector.extract_strided_slice %3 {offsets = [0, 28], sizes = [8, 1], strides = [1, 1]} : vector<8x128xi32> to vector<8x1xi32>
    %175 = vector.broadcast %174 : vector<8x1xi32> to vector<8x128xi32>
    %176 = arith.cmpi eq, %175, %4 : vector<8x128xi32>
    %177 = arith.extui %176 : vector<8x128xi1> to vector<8x128xi32>
    %178 = arith.sitofp %177 : vector<8x128xi32> to vector<8x128xf32>
    %179 = arith.addf %173, %178 : vector<8x128xf32>
    %180 = vector.extract_strided_slice %3 {offsets = [0, 29], sizes = [8, 1], strides = [1, 1]} : vector<8x128xi32> to vector<8x1xi32>
    %181 = vector.broadcast %180 : vector<8x1xi32> to vector<8x128xi32>
    %182 = arith.cmpi eq, %181, %4 : vector<8x128xi32>
    %183 = arith.extui %182 : vector<8x128xi1> to vector<8x128xi32>
    %184 = arith.sitofp %183 : vector<8x128xi32> to vector<8x128xf32>
    %185 = arith.addf %179, %184 : vector<8x128xf32>
    %186 = vector.extract_strided_slice %3 {offsets = [0, 30], sizes = [8, 1], strides = [1, 1]} : vector<8x128xi32> to vector<8x1xi32>
    %187 = vector.broadcast %186 : vector<8x1xi32> to vector<8x128xi32>
    %188 = arith.cmpi eq, %187, %4 : vector<8x128xi32>
    %189 = arith.extui %188 : vector<8x128xi1> to vector<8x128xi32>
    %190 = arith.sitofp %189 : vector<8x128xi32> to vector<8x128xf32>
    %191 = arith.addf %185, %190 : vector<8x128xf32>
    %192 = vector.extract_strided_slice %3 {offsets = [0, 31], sizes = [8, 1], strides = [1, 1]} : vector<8x128xi32> to vector<8x1xi32>
    %193 = vector.broadcast %192 : vector<8x1xi32> to vector<8x128xi32>
    %194 = arith.cmpi eq, %193, %4 : vector<8x128xi32>
    %195 = arith.extui %194 : vector<8x128xi1> to vector<8x128xi32>
    %196 = arith.sitofp %195 : vector<8x128xi32> to vector<8x128xf32>
    %197 = arith.addf %191, %196 : vector<8x128xf32>
    %198 = vector.extract_strided_slice %3 {offsets = [0, 32], sizes = [8, 1], strides = [1, 1]} : vector<8x128xi32> to vector<8x1xi32>
    %199 = vector.broadcast %198 : vector<8x1xi32> to vector<8x128xi32>
    %200 = arith.cmpi eq, %199, %4 : vector<8x128xi32>
    %201 = arith.extui %200 : vector<8x128xi1> to vector<8x128xi32>
    %202 = arith.sitofp %201 : vector<8x128xi32> to vector<8x128xf32>
    %203 = arith.addf %197, %202 : vector<8x128xf32>
    %204 = vector.extract_strided_slice %3 {offsets = [0, 33], sizes = [8, 1], strides = [1, 1]} : vector<8x128xi32> to vector<8x1xi32>
    %205 = vector.broadcast %204 : vector<8x1xi32> to vector<8x128xi32>
    %206 = arith.cmpi eq, %205, %4 : vector<8x128xi32>
    %207 = arith.extui %206 : vector<8x128xi1> to vector<8x128xi32>
    %208 = arith.sitofp %207 : vector<8x128xi32> to vector<8x128xf32>
    %209 = arith.addf %203, %208 : vector<8x128xf32>
    %210 = vector.extract_strided_slice %3 {offsets = [0, 34], sizes = [8, 1], strides = [1, 1]} : vector<8x128xi32> to vector<8x1xi32>
    %211 = vector.broadcast %210 : vector<8x1xi32> to vector<8x128xi32>
    %212 = arith.cmpi eq, %211, %4 : vector<8x128xi32>
    %213 = arith.extui %212 : vector<8x128xi1> to vector<8x128xi32>
    %214 = arith.sitofp %213 : vector<8x128xi32> to vector<8x128xf32>
    %215 = arith.addf %209, %214 : vector<8x128xf32>
    %216 = vector.extract_strided_slice %3 {offsets = [0, 35], sizes = [8, 1], strides = [1, 1]} : vector<8x128xi32> to vector<8x1xi32>
    %217 = vector.broadcast %216 : vector<8x1xi32> to vector<8x128xi32>
    %218 = arith.cmpi eq, %217, %4 : vector<8x128xi32>
    %219 = arith.extui %218 : vector<8x128xi1> to vector<8x128xi32>
    %220 = arith.sitofp %219 : vector<8x128xi32> to vector<8x128xf32>
    %221 = arith.addf %215, %220 : vector<8x128xf32>
    %222 = vector.extract_strided_slice %3 {offsets = [0, 36], sizes = [8, 1], strides = [1, 1]} : vector<8x128xi32> to vector<8x1xi32>
    %223 = vector.broadcast %222 : vector<8x1xi32> to vector<8x128xi32>
    %224 = arith.cmpi eq, %223, %4 : vector<8x128xi32>
    %225 = arith.extui %224 : vector<8x128xi1> to vector<8x128xi32>
    %226 = arith.sitofp %225 : vector<8x128xi32> to vector<8x128xf32>
    %227 = arith.addf %221, %226 : vector<8x128xf32>
    %228 = vector.extract_strided_slice %3 {offsets = [0, 37], sizes = [8, 1], strides = [1, 1]} : vector<8x128xi32> to vector<8x1xi32>
    %229 = vector.broadcast %228 : vector<8x1xi32> to vector<8x128xi32>
    %230 = arith.cmpi eq, %229, %4 : vector<8x128xi32>
    %231 = arith.extui %230 : vector<8x128xi1> to vector<8x128xi32>
    %232 = arith.sitofp %231 : vector<8x128xi32> to vector<8x128xf32>
    %233 = arith.addf %227, %232 : vector<8x128xf32>
    %234 = vector.extract_strided_slice %3 {offsets = [0, 38], sizes = [8, 1], strides = [1, 1]} : vector<8x128xi32> to vector<8x1xi32>
    %235 = vector.broadcast %234 : vector<8x1xi32> to vector<8x128xi32>
    %236 = arith.cmpi eq, %235, %4 : vector<8x128xi32>
    %237 = arith.extui %236 : vector<8x128xi1> to vector<8x128xi32>
    %238 = arith.sitofp %237 : vector<8x128xi32> to vector<8x128xf32>
    %239 = arith.addf %233, %238 : vector<8x128xf32>
    %240 = vector.extract_strided_slice %3 {offsets = [0, 39], sizes = [8, 1], strides = [1, 1]} : vector<8x128xi32> to vector<8x1xi32>
    %241 = vector.broadcast %240 : vector<8x1xi32> to vector<8x128xi32>
    %242 = arith.cmpi eq, %241, %4 : vector<8x128xi32>
    %243 = arith.extui %242 : vector<8x128xi1> to vector<8x128xi32>
    %244 = arith.sitofp %243 : vector<8x128xi32> to vector<8x128xf32>
    %245 = arith.addf %239, %244 : vector<8x128xf32>
    %246 = vector.extract_strided_slice %3 {offsets = [0, 40], sizes = [8, 1], strides = [1, 1]} : vector<8x128xi32> to vector<8x1xi32>
    %247 = vector.broadcast %246 : vector<8x1xi32> to vector<8x128xi32>
    %248 = arith.cmpi eq, %247, %4 : vector<8x128xi32>
    %249 = arith.extui %248 : vector<8x128xi1> to vector<8x128xi32>
    %250 = arith.sitofp %249 : vector<8x128xi32> to vector<8x128xf32>
    %251 = arith.addf %245, %250 : vector<8x128xf32>
    %252 = vector.extract_strided_slice %3 {offsets = [0, 41], sizes = [8, 1], strides = [1, 1]} : vector<8x128xi32> to vector<8x1xi32>
    %253 = vector.broadcast %252 : vector<8x1xi32> to vector<8x128xi32>
    %254 = arith.cmpi eq, %253, %4 : vector<8x128xi32>
    %255 = arith.extui %254 : vector<8x128xi1> to vector<8x128xi32>
    %256 = arith.sitofp %255 : vector<8x128xi32> to vector<8x128xf32>
    %257 = arith.addf %251, %256 : vector<8x128xf32>
    %258 = vector.extract_strided_slice %3 {offsets = [0, 42], sizes = [8, 1], strides = [1, 1]} : vector<8x128xi32> to vector<8x1xi32>
    %259 = vector.broadcast %258 : vector<8x1xi32> to vector<8x128xi32>
    %260 = arith.cmpi eq, %259, %4 : vector<8x128xi32>
    %261 = arith.extui %260 : vector<8x128xi1> to vector<8x128xi32>
    %262 = arith.sitofp %261 : vector<8x128xi32> to vector<8x128xf32>
    %263 = arith.addf %257, %262 : vector<8x128xf32>
    %264 = vector.extract_strided_slice %3 {offsets = [0, 43], sizes = [8, 1], strides = [1, 1]} : vector<8x128xi32> to vector<8x1xi32>
    %265 = vector.broadcast %264 : vector<8x1xi32> to vector<8x128xi32>
    %266 = arith.cmpi eq, %265, %4 : vector<8x128xi32>
    %267 = arith.extui %266 : vector<8x128xi1> to vector<8x128xi32>
    %268 = arith.sitofp %267 : vector<8x128xi32> to vector<8x128xf32>
    %269 = arith.addf %263, %268 : vector<8x128xf32>
    %270 = vector.extract_strided_slice %3 {offsets = [0, 44], sizes = [8, 1], strides = [1, 1]} : vector<8x128xi32> to vector<8x1xi32>
    %271 = vector.broadcast %270 : vector<8x1xi32> to vector<8x128xi32>
    %272 = arith.cmpi eq, %271, %4 : vector<8x128xi32>
    %273 = arith.extui %272 : vector<8x128xi1> to vector<8x128xi32>
    %274 = arith.sitofp %273 : vector<8x128xi32> to vector<8x128xf32>
    %275 = arith.addf %269, %274 : vector<8x128xf32>
    %276 = vector.extract_strided_slice %3 {offsets = [0, 45], sizes = [8, 1], strides = [1, 1]} : vector<8x128xi32> to vector<8x1xi32>
    %277 = vector.broadcast %276 : vector<8x1xi32> to vector<8x128xi32>
    %278 = arith.cmpi eq, %277, %4 : vector<8x128xi32>
    %279 = arith.extui %278 : vector<8x128xi1> to vector<8x128xi32>
    %280 = arith.sitofp %279 : vector<8x128xi32> to vector<8x128xf32>
    %281 = arith.addf %275, %280 : vector<8x128xf32>
    %282 = vector.extract_strided_slice %3 {offsets = [0, 46], sizes = [8, 1], strides = [1, 1]} : vector<8x128xi32> to vector<8x1xi32>
    %283 = vector.broadcast %282 : vector<8x1xi32> to vector<8x128xi32>
    %284 = arith.cmpi eq, %283, %4 : vector<8x128xi32>
    %285 = arith.extui %284 : vector<8x128xi1> to vector<8x128xi32>
    %286 = arith.sitofp %285 : vector<8x128xi32> to vector<8x128xf32>
    %287 = arith.addf %281, %286 : vector<8x128xf32>
    %288 = vector.extract_strided_slice %3 {offsets = [0, 47], sizes = [8, 1], strides = [1, 1]} : vector<8x128xi32> to vector<8x1xi32>
    %289 = vector.broadcast %288 : vector<8x1xi32> to vector<8x128xi32>
    %290 = arith.cmpi eq, %289, %4 : vector<8x128xi32>
    %291 = arith.extui %290 : vector<8x128xi1> to vector<8x128xi32>
    %292 = arith.sitofp %291 : vector<8x128xi32> to vector<8x128xf32>
    %293 = arith.addf %287, %292 : vector<8x128xf32>
    %294 = vector.extract_strided_slice %3 {offsets = [0, 48], sizes = [8, 1], strides = [1, 1]} : vector<8x128xi32> to vector<8x1xi32>
    %295 = vector.broadcast %294 : vector<8x1xi32> to vector<8x128xi32>
    %296 = arith.cmpi eq, %295, %4 : vector<8x128xi32>
    %297 = arith.extui %296 : vector<8x128xi1> to vector<8x128xi32>
    %298 = arith.sitofp %297 : vector<8x128xi32> to vector<8x128xf32>
    %299 = arith.addf %293, %298 : vector<8x128xf32>
    %300 = vector.extract_strided_slice %3 {offsets = [0, 49], sizes = [8, 1], strides = [1, 1]} : vector<8x128xi32> to vector<8x1xi32>
    %301 = vector.broadcast %300 : vector<8x1xi32> to vector<8x128xi32>
    %302 = arith.cmpi eq, %301, %4 : vector<8x128xi32>
    %303 = arith.extui %302 : vector<8x128xi1> to vector<8x128xi32>
    %304 = arith.sitofp %303 : vector<8x128xi32> to vector<8x128xf32>
    %305 = arith.addf %299, %304 : vector<8x128xf32>
    %306 = vector.extract_strided_slice %3 {offsets = [0, 50], sizes = [8, 1], strides = [1, 1]} : vector<8x128xi32> to vector<8x1xi32>
    %307 = vector.broadcast %306 : vector<8x1xi32> to vector<8x128xi32>
    %308 = arith.cmpi eq, %307, %4 : vector<8x128xi32>
    %309 = arith.extui %308 : vector<8x128xi1> to vector<8x128xi32>
    %310 = arith.sitofp %309 : vector<8x128xi32> to vector<8x128xf32>
    %311 = arith.addf %305, %310 : vector<8x128xf32>
    %312 = vector.extract_strided_slice %3 {offsets = [0, 51], sizes = [8, 1], strides = [1, 1]} : vector<8x128xi32> to vector<8x1xi32>
    %313 = vector.broadcast %312 : vector<8x1xi32> to vector<8x128xi32>
    %314 = arith.cmpi eq, %313, %4 : vector<8x128xi32>
    %315 = arith.extui %314 : vector<8x128xi1> to vector<8x128xi32>
    %316 = arith.sitofp %315 : vector<8x128xi32> to vector<8x128xf32>
    %317 = arith.addf %311, %316 : vector<8x128xf32>
    %318 = vector.extract_strided_slice %3 {offsets = [0, 52], sizes = [8, 1], strides = [1, 1]} : vector<8x128xi32> to vector<8x1xi32>
    %319 = vector.broadcast %318 : vector<8x1xi32> to vector<8x128xi32>
    %320 = arith.cmpi eq, %319, %4 : vector<8x128xi32>
    %321 = arith.extui %320 : vector<8x128xi1> to vector<8x128xi32>
    %322 = arith.sitofp %321 : vector<8x128xi32> to vector<8x128xf32>
    %323 = arith.addf %317, %322 : vector<8x128xf32>
    %324 = vector.extract_strided_slice %3 {offsets = [0, 53], sizes = [8, 1], strides = [1, 1]} : vector<8x128xi32> to vector<8x1xi32>
    %325 = vector.broadcast %324 : vector<8x1xi32> to vector<8x128xi32>
    %326 = arith.cmpi eq, %325, %4 : vector<8x128xi32>
    %327 = arith.extui %326 : vector<8x128xi1> to vector<8x128xi32>
    %328 = arith.sitofp %327 : vector<8x128xi32> to vector<8x128xf32>
    %329 = arith.addf %323, %328 : vector<8x128xf32>
    %330 = vector.extract_strided_slice %3 {offsets = [0, 54], sizes = [8, 1], strides = [1, 1]} : vector<8x128xi32> to vector<8x1xi32>
    %331 = vector.broadcast %330 : vector<8x1xi32> to vector<8x128xi32>
    %332 = arith.cmpi eq, %331, %4 : vector<8x128xi32>
    %333 = arith.extui %332 : vector<8x128xi1> to vector<8x128xi32>
    %334 = arith.sitofp %333 : vector<8x128xi32> to vector<8x128xf32>
    %335 = arith.addf %329, %334 : vector<8x128xf32>
    %336 = vector.extract_strided_slice %3 {offsets = [0, 55], sizes = [8, 1], strides = [1, 1]} : vector<8x128xi32> to vector<8x1xi32>
    %337 = vector.broadcast %336 : vector<8x1xi32> to vector<8x128xi32>
    %338 = arith.cmpi eq, %337, %4 : vector<8x128xi32>
    %339 = arith.extui %338 : vector<8x128xi1> to vector<8x128xi32>
    %340 = arith.sitofp %339 : vector<8x128xi32> to vector<8x128xf32>
    %341 = arith.addf %335, %340 : vector<8x128xf32>
    %342 = vector.extract_strided_slice %3 {offsets = [0, 56], sizes = [8, 1], strides = [1, 1]} : vector<8x128xi32> to vector<8x1xi32>
    %343 = vector.broadcast %342 : vector<8x1xi32> to vector<8x128xi32>
    %344 = arith.cmpi eq, %343, %4 : vector<8x128xi32>
    %345 = arith.extui %344 : vector<8x128xi1> to vector<8x128xi32>
    %346 = arith.sitofp %345 : vector<8x128xi32> to vector<8x128xf32>
    %347 = arith.addf %341, %346 : vector<8x128xf32>
    %348 = vector.extract_strided_slice %3 {offsets = [0, 57], sizes = [8, 1], strides = [1, 1]} : vector<8x128xi32> to vector<8x1xi32>
    %349 = vector.broadcast %348 : vector<8x1xi32> to vector<8x128xi32>
    %350 = arith.cmpi eq, %349, %4 : vector<8x128xi32>
    %351 = arith.extui %350 : vector<8x128xi1> to vector<8x128xi32>
    %352 = arith.sitofp %351 : vector<8x128xi32> to vector<8x128xf32>
    %353 = arith.addf %347, %352 : vector<8x128xf32>
    %354 = vector.extract_strided_slice %3 {offsets = [0, 58], sizes = [8, 1], strides = [1, 1]} : vector<8x128xi32> to vector<8x1xi32>
    %355 = vector.broadcast %354 : vector<8x1xi32> to vector<8x128xi32>
    %356 = arith.cmpi eq, %355, %4 : vector<8x128xi32>
    %357 = arith.extui %356 : vector<8x128xi1> to vector<8x128xi32>
    %358 = arith.sitofp %357 : vector<8x128xi32> to vector<8x128xf32>
    %359 = arith.addf %353, %358 : vector<8x128xf32>
    %360 = vector.extract_strided_slice %3 {offsets = [0, 59], sizes = [8, 1], strides = [1, 1]} : vector<8x128xi32> to vector<8x1xi32>
    %361 = vector.broadcast %360 : vector<8x1xi32> to vector<8x128xi32>
    %362 = arith.cmpi eq, %361, %4 : vector<8x128xi32>
    %363 = arith.extui %362 : vector<8x128xi1> to vector<8x128xi32>
    %364 = arith.sitofp %363 : vector<8x128xi32> to vector<8x128xf32>
    %365 = arith.addf %359, %364 : vector<8x128xf32>
    %366 = vector.extract_strided_slice %3 {offsets = [0, 60], sizes = [8, 1], strides = [1, 1]} : vector<8x128xi32> to vector<8x1xi32>
    %367 = vector.broadcast %366 : vector<8x1xi32> to vector<8x128xi32>
    %368 = arith.cmpi eq, %367, %4 : vector<8x128xi32>
    %369 = arith.extui %368 : vector<8x128xi1> to vector<8x128xi32>
    %370 = arith.sitofp %369 : vector<8x128xi32> to vector<8x128xf32>
    %371 = arith.addf %365, %370 : vector<8x128xf32>
    %372 = vector.extract_strided_slice %3 {offsets = [0, 61], sizes = [8, 1], strides = [1, 1]} : vector<8x128xi32> to vector<8x1xi32>
    %373 = vector.broadcast %372 : vector<8x1xi32> to vector<8x128xi32>
    %374 = arith.cmpi eq, %373, %4 : vector<8x128xi32>
    %375 = arith.extui %374 : vector<8x128xi1> to vector<8x128xi32>
    %376 = arith.sitofp %375 : vector<8x128xi32> to vector<8x128xf32>
    %377 = arith.addf %371, %376 : vector<8x128xf32>
    %378 = vector.extract_strided_slice %3 {offsets = [0, 62], sizes = [8, 1], strides = [1, 1]} : vector<8x128xi32> to vector<8x1xi32>
    %379 = vector.broadcast %378 : vector<8x1xi32> to vector<8x128xi32>
    %380 = arith.cmpi eq, %379, %4 : vector<8x128xi32>
    %381 = arith.extui %380 : vector<8x128xi1> to vector<8x128xi32>
    %382 = arith.sitofp %381 : vector<8x128xi32> to vector<8x128xf32>
    %383 = arith.addf %377, %382 : vector<8x128xf32>
    %384 = vector.extract_strided_slice %3 {offsets = [0, 63], sizes = [8, 1], strides = [1, 1]} : vector<8x128xi32> to vector<8x1xi32>
    %385 = vector.broadcast %384 : vector<8x1xi32> to vector<8x128xi32>
    %386 = arith.cmpi eq, %385, %4 : vector<8x128xi32>
    %387 = arith.extui %386 : vector<8x128xi1> to vector<8x128xi32>
    %388 = arith.sitofp %387 : vector<8x128xi32> to vector<8x128xf32>
    %389 = arith.addf %383, %388 : vector<8x128xf32>
    %390 = vector.extract_strided_slice %3 {offsets = [0, 64], sizes = [8, 1], strides = [1, 1]} : vector<8x128xi32> to vector<8x1xi32>
    %391 = vector.broadcast %390 : vector<8x1xi32> to vector<8x128xi32>
    %392 = arith.cmpi eq, %391, %4 : vector<8x128xi32>
    %393 = arith.extui %392 : vector<8x128xi1> to vector<8x128xi32>
    %394 = arith.sitofp %393 : vector<8x128xi32> to vector<8x128xf32>
    %395 = arith.addf %389, %394 : vector<8x128xf32>
    %396 = vector.extract_strided_slice %3 {offsets = [0, 65], sizes = [8, 1], strides = [1, 1]} : vector<8x128xi32> to vector<8x1xi32>
    %397 = vector.broadcast %396 : vector<8x1xi32> to vector<8x128xi32>
    %398 = arith.cmpi eq, %397, %4 : vector<8x128xi32>
    %399 = arith.extui %398 : vector<8x128xi1> to vector<8x128xi32>
    %400 = arith.sitofp %399 : vector<8x128xi32> to vector<8x128xf32>
    %401 = arith.addf %395, %400 : vector<8x128xf32>
    %402 = vector.extract_strided_slice %3 {offsets = [0, 66], sizes = [8, 1], strides = [1, 1]} : vector<8x128xi32> to vector<8x1xi32>
    %403 = vector.broadcast %402 : vector<8x1xi32> to vector<8x128xi32>
    %404 = arith.cmpi eq, %403, %4 : vector<8x128xi32>
    %405 = arith.extui %404 : vector<8x128xi1> to vector<8x128xi32>
    %406 = arith.sitofp %405 : vector<8x128xi32> to vector<8x128xf32>
    %407 = arith.addf %401, %406 : vector<8x128xf32>
    %408 = vector.extract_strided_slice %3 {offsets = [0, 67], sizes = [8, 1], strides = [1, 1]} : vector<8x128xi32> to vector<8x1xi32>
    %409 = vector.broadcast %408 : vector<8x1xi32> to vector<8x128xi32>
    %410 = arith.cmpi eq, %409, %4 : vector<8x128xi32>
    %411 = arith.extui %410 : vector<8x128xi1> to vector<8x128xi32>
    %412 = arith.sitofp %411 : vector<8x128xi32> to vector<8x128xf32>
    %413 = arith.addf %407, %412 : vector<8x128xf32>
    %414 = vector.extract_strided_slice %3 {offsets = [0, 68], sizes = [8, 1], strides = [1, 1]} : vector<8x128xi32> to vector<8x1xi32>
    %415 = vector.broadcast %414 : vector<8x1xi32> to vector<8x128xi32>
    %416 = arith.cmpi eq, %415, %4 : vector<8x128xi32>
    %417 = arith.extui %416 : vector<8x128xi1> to vector<8x128xi32>
    %418 = arith.sitofp %417 : vector<8x128xi32> to vector<8x128xf32>
    %419 = arith.addf %413, %418 : vector<8x128xf32>
    %420 = vector.extract_strided_slice %3 {offsets = [0, 69], sizes = [8, 1], strides = [1, 1]} : vector<8x128xi32> to vector<8x1xi32>
    %421 = vector.broadcast %420 : vector<8x1xi32> to vector<8x128xi32>
    %422 = arith.cmpi eq, %421, %4 : vector<8x128xi32>
    %423 = arith.extui %422 : vector<8x128xi1> to vector<8x128xi32>
    %424 = arith.sitofp %423 : vector<8x128xi32> to vector<8x128xf32>
    %425 = arith.addf %419, %424 : vector<8x128xf32>
    %426 = vector.extract_strided_slice %3 {offsets = [0, 70], sizes = [8, 1], strides = [1, 1]} : vector<8x128xi32> to vector<8x1xi32>
    %427 = vector.broadcast %426 : vector<8x1xi32> to vector<8x128xi32>
    %428 = arith.cmpi eq, %427, %4 : vector<8x128xi32>
    %429 = arith.extui %428 : vector<8x128xi1> to vector<8x128xi32>
    %430 = arith.sitofp %429 : vector<8x128xi32> to vector<8x128xf32>
    %431 = arith.addf %425, %430 : vector<8x128xf32>
    %432 = vector.extract_strided_slice %3 {offsets = [0, 71], sizes = [8, 1], strides = [1, 1]} : vector<8x128xi32> to vector<8x1xi32>
    %433 = vector.broadcast %432 : vector<8x1xi32> to vector<8x128xi32>
    %434 = arith.cmpi eq, %433, %4 : vector<8x128xi32>
    %435 = arith.extui %434 : vector<8x128xi1> to vector<8x128xi32>
    %436 = arith.sitofp %435 : vector<8x128xi32> to vector<8x128xf32>
    %437 = arith.addf %431, %436 : vector<8x128xf32>
    %438 = vector.extract_strided_slice %3 {offsets = [0, 72], sizes = [8, 1], strides = [1, 1]} : vector<8x128xi32> to vector<8x1xi32>
    %439 = vector.broadcast %438 : vector<8x1xi32> to vector<8x128xi32>
    %440 = arith.cmpi eq, %439, %4 : vector<8x128xi32>
    %441 = arith.extui %440 : vector<8x128xi1> to vector<8x128xi32>
    %442 = arith.sitofp %441 : vector<8x128xi32> to vector<8x128xf32>
    %443 = arith.addf %437, %442 : vector<8x128xf32>
    %444 = vector.extract_strided_slice %3 {offsets = [0, 73], sizes = [8, 1], strides = [1, 1]} : vector<8x128xi32> to vector<8x1xi32>
    %445 = vector.broadcast %444 : vector<8x1xi32> to vector<8x128xi32>
    %446 = arith.cmpi eq, %445, %4 : vector<8x128xi32>
    %447 = arith.extui %446 : vector<8x128xi1> to vector<8x128xi32>
    %448 = arith.sitofp %447 : vector<8x128xi32> to vector<8x128xf32>
    %449 = arith.addf %443, %448 : vector<8x128xf32>
    %450 = vector.extract_strided_slice %3 {offsets = [0, 74], sizes = [8, 1], strides = [1, 1]} : vector<8x128xi32> to vector<8x1xi32>
    %451 = vector.broadcast %450 : vector<8x1xi32> to vector<8x128xi32>
    %452 = arith.cmpi eq, %451, %4 : vector<8x128xi32>
    %453 = arith.extui %452 : vector<8x128xi1> to vector<8x128xi32>
    %454 = arith.sitofp %453 : vector<8x128xi32> to vector<8x128xf32>
    %455 = arith.addf %449, %454 : vector<8x128xf32>
    %456 = vector.extract_strided_slice %3 {offsets = [0, 75], sizes = [8, 1], strides = [1, 1]} : vector<8x128xi32> to vector<8x1xi32>
    %457 = vector.broadcast %456 : vector<8x1xi32> to vector<8x128xi32>
    %458 = arith.cmpi eq, %457, %4 : vector<8x128xi32>
    %459 = arith.extui %458 : vector<8x128xi1> to vector<8x128xi32>
    %460 = arith.sitofp %459 : vector<8x128xi32> to vector<8x128xf32>
    %461 = arith.addf %455, %460 : vector<8x128xf32>
    %462 = vector.extract_strided_slice %3 {offsets = [0, 76], sizes = [8, 1], strides = [1, 1]} : vector<8x128xi32> to vector<8x1xi32>
    %463 = vector.broadcast %462 : vector<8x1xi32> to vector<8x128xi32>
    %464 = arith.cmpi eq, %463, %4 : vector<8x128xi32>
    %465 = arith.extui %464 : vector<8x128xi1> to vector<8x128xi32>
    %466 = arith.sitofp %465 : vector<8x128xi32> to vector<8x128xf32>
    %467 = arith.addf %461, %466 : vector<8x128xf32>
    %468 = vector.extract_strided_slice %3 {offsets = [0, 77], sizes = [8, 1], strides = [1, 1]} : vector<8x128xi32> to vector<8x1xi32>
    %469 = vector.broadcast %468 : vector<8x1xi32> to vector<8x128xi32>
    %470 = arith.cmpi eq, %469, %4 : vector<8x128xi32>
    %471 = arith.extui %470 : vector<8x128xi1> to vector<8x128xi32>
    %472 = arith.sitofp %471 : vector<8x128xi32> to vector<8x128xf32>
    %473 = arith.addf %467, %472 : vector<8x128xf32>
    %474 = vector.extract_strided_slice %3 {offsets = [0, 78], sizes = [8, 1], strides = [1, 1]} : vector<8x128xi32> to vector<8x1xi32>
    %475 = vector.broadcast %474 : vector<8x1xi32> to vector<8x128xi32>
    %476 = arith.cmpi eq, %475, %4 : vector<8x128xi32>
    %477 = arith.extui %476 : vector<8x128xi1> to vector<8x128xi32>
    %478 = arith.sitofp %477 : vector<8x128xi32> to vector<8x128xf32>
    %479 = arith.addf %473, %478 : vector<8x128xf32>
    %480 = vector.extract_strided_slice %3 {offsets = [0, 79], sizes = [8, 1], strides = [1, 1]} : vector<8x128xi32> to vector<8x1xi32>
    %481 = vector.broadcast %480 : vector<8x1xi32> to vector<8x128xi32>
    %482 = arith.cmpi eq, %481, %4 : vector<8x128xi32>
    %483 = arith.extui %482 : vector<8x128xi1> to vector<8x128xi32>
    %484 = arith.sitofp %483 : vector<8x128xi32> to vector<8x128xf32>
    %485 = arith.addf %479, %484 : vector<8x128xf32>
    %486 = vector.extract_strided_slice %3 {offsets = [0, 80], sizes = [8, 1], strides = [1, 1]} : vector<8x128xi32> to vector<8x1xi32>
    %487 = vector.broadcast %486 : vector<8x1xi32> to vector<8x128xi32>
    %488 = arith.cmpi eq, %487, %4 : vector<8x128xi32>
    %489 = arith.extui %488 : vector<8x128xi1> to vector<8x128xi32>
    %490 = arith.sitofp %489 : vector<8x128xi32> to vector<8x128xf32>
    %491 = arith.addf %485, %490 : vector<8x128xf32>
    %492 = vector.extract_strided_slice %3 {offsets = [0, 81], sizes = [8, 1], strides = [1, 1]} : vector<8x128xi32> to vector<8x1xi32>
    %493 = vector.broadcast %492 : vector<8x1xi32> to vector<8x128xi32>
    %494 = arith.cmpi eq, %493, %4 : vector<8x128xi32>
    %495 = arith.extui %494 : vector<8x128xi1> to vector<8x128xi32>
    %496 = arith.sitofp %495 : vector<8x128xi32> to vector<8x128xf32>
    %497 = arith.addf %491, %496 : vector<8x128xf32>
    %498 = vector.extract_strided_slice %3 {offsets = [0, 82], sizes = [8, 1], strides = [1, 1]} : vector<8x128xi32> to vector<8x1xi32>
    %499 = vector.broadcast %498 : vector<8x1xi32> to vector<8x128xi32>
    %500 = arith.cmpi eq, %499, %4 : vector<8x128xi32>
    %501 = arith.extui %500 : vector<8x128xi1> to vector<8x128xi32>
    %502 = arith.sitofp %501 : vector<8x128xi32> to vector<8x128xf32>
    %503 = arith.addf %497, %502 : vector<8x128xf32>
    %504 = vector.extract_strided_slice %3 {offsets = [0, 83], sizes = [8, 1], strides = [1, 1]} : vector<8x128xi32> to vector<8x1xi32>
    %505 = vector.broadcast %504 : vector<8x1xi32> to vector<8x128xi32>
    %506 = arith.cmpi eq, %505, %4 : vector<8x128xi32>
    %507 = arith.extui %506 : vector<8x128xi1> to vector<8x128xi32>
    %508 = arith.sitofp %507 : vector<8x128xi32> to vector<8x128xf32>
    %509 = arith.addf %503, %508 : vector<8x128xf32>
    %510 = vector.extract_strided_slice %3 {offsets = [0, 84], sizes = [8, 1], strides = [1, 1]} : vector<8x128xi32> to vector<8x1xi32>
    %511 = vector.broadcast %510 : vector<8x1xi32> to vector<8x128xi32>
    %512 = arith.cmpi eq, %511, %4 : vector<8x128xi32>
    %513 = arith.extui %512 : vector<8x128xi1> to vector<8x128xi32>
    %514 = arith.sitofp %513 : vector<8x128xi32> to vector<8x128xf32>
    %515 = arith.addf %509, %514 : vector<8x128xf32>
    %516 = vector.extract_strided_slice %3 {offsets = [0, 85], sizes = [8, 1], strides = [1, 1]} : vector<8x128xi32> to vector<8x1xi32>
    %517 = vector.broadcast %516 : vector<8x1xi32> to vector<8x128xi32>
    %518 = arith.cmpi eq, %517, %4 : vector<8x128xi32>
    %519 = arith.extui %518 : vector<8x128xi1> to vector<8x128xi32>
    %520 = arith.sitofp %519 : vector<8x128xi32> to vector<8x128xf32>
    %521 = arith.addf %515, %520 : vector<8x128xf32>
    %522 = vector.extract_strided_slice %3 {offsets = [0, 86], sizes = [8, 1], strides = [1, 1]} : vector<8x128xi32> to vector<8x1xi32>
    %523 = vector.broadcast %522 : vector<8x1xi32> to vector<8x128xi32>
    %524 = arith.cmpi eq, %523, %4 : vector<8x128xi32>
    %525 = arith.extui %524 : vector<8x128xi1> to vector<8x128xi32>
    %526 = arith.sitofp %525 : vector<8x128xi32> to vector<8x128xf32>
    %527 = arith.addf %521, %526 : vector<8x128xf32>
    %528 = vector.extract_strided_slice %3 {offsets = [0, 87], sizes = [8, 1], strides = [1, 1]} : vector<8x128xi32> to vector<8x1xi32>
    %529 = vector.broadcast %528 : vector<8x1xi32> to vector<8x128xi32>
    %530 = arith.cmpi eq, %529, %4 : vector<8x128xi32>
    %531 = arith.extui %530 : vector<8x128xi1> to vector<8x128xi32>
    %532 = arith.sitofp %531 : vector<8x128xi32> to vector<8x128xf32>
    %533 = arith.addf %527, %532 : vector<8x128xf32>
    %534 = vector.extract_strided_slice %3 {offsets = [0, 88], sizes = [8, 1], strides = [1, 1]} : vector<8x128xi32> to vector<8x1xi32>
    %535 = vector.broadcast %534 : vector<8x1xi32> to vector<8x128xi32>
    %536 = arith.cmpi eq, %535, %4 : vector<8x128xi32>
    %537 = arith.extui %536 : vector<8x128xi1> to vector<8x128xi32>
    %538 = arith.sitofp %537 : vector<8x128xi32> to vector<8x128xf32>
    %539 = arith.addf %533, %538 : vector<8x128xf32>
    %540 = vector.extract_strided_slice %3 {offsets = [0, 89], sizes = [8, 1], strides = [1, 1]} : vector<8x128xi32> to vector<8x1xi32>
    %541 = vector.broadcast %540 : vector<8x1xi32> to vector<8x128xi32>
    %542 = arith.cmpi eq, %541, %4 : vector<8x128xi32>
    %543 = arith.extui %542 : vector<8x128xi1> to vector<8x128xi32>
    %544 = arith.sitofp %543 : vector<8x128xi32> to vector<8x128xf32>
    %545 = arith.addf %539, %544 : vector<8x128xf32>
    %546 = vector.extract_strided_slice %3 {offsets = [0, 90], sizes = [8, 1], strides = [1, 1]} : vector<8x128xi32> to vector<8x1xi32>
    %547 = vector.broadcast %546 : vector<8x1xi32> to vector<8x128xi32>
    %548 = arith.cmpi eq, %547, %4 : vector<8x128xi32>
    %549 = arith.extui %548 : vector<8x128xi1> to vector<8x128xi32>
    %550 = arith.sitofp %549 : vector<8x128xi32> to vector<8x128xf32>
    %551 = arith.addf %545, %550 : vector<8x128xf32>
    %552 = vector.extract_strided_slice %3 {offsets = [0, 91], sizes = [8, 1], strides = [1, 1]} : vector<8x128xi32> to vector<8x1xi32>
    %553 = vector.broadcast %552 : vector<8x1xi32> to vector<8x128xi32>
    %554 = arith.cmpi eq, %553, %4 : vector<8x128xi32>
    %555 = arith.extui %554 : vector<8x128xi1> to vector<8x128xi32>
    %556 = arith.sitofp %555 : vector<8x128xi32> to vector<8x128xf32>
    %557 = arith.addf %551, %556 : vector<8x128xf32>
    %558 = vector.extract_strided_slice %3 {offsets = [0, 92], sizes = [8, 1], strides = [1, 1]} : vector<8x128xi32> to vector<8x1xi32>
    %559 = vector.broadcast %558 : vector<8x1xi32> to vector<8x128xi32>
    %560 = arith.cmpi eq, %559, %4 : vector<8x128xi32>
    %561 = arith.extui %560 : vector<8x128xi1> to vector<8x128xi32>
    %562 = arith.sitofp %561 : vector<8x128xi32> to vector<8x128xf32>
    %563 = arith.addf %557, %562 : vector<8x128xf32>
    %564 = vector.extract_strided_slice %3 {offsets = [0, 93], sizes = [8, 1], strides = [1, 1]} : vector<8x128xi32> to vector<8x1xi32>
    %565 = vector.broadcast %564 : vector<8x1xi32> to vector<8x128xi32>
    %566 = arith.cmpi eq, %565, %4 : vector<8x128xi32>
    %567 = arith.extui %566 : vector<8x128xi1> to vector<8x128xi32>
    %568 = arith.sitofp %567 : vector<8x128xi32> to vector<8x128xf32>
    %569 = arith.addf %563, %568 : vector<8x128xf32>
    %570 = vector.extract_strided_slice %3 {offsets = [0, 94], sizes = [8, 1], strides = [1, 1]} : vector<8x128xi32> to vector<8x1xi32>
    %571 = vector.broadcast %570 : vector<8x1xi32> to vector<8x128xi32>
    %572 = arith.cmpi eq, %571, %4 : vector<8x128xi32>
    %573 = arith.extui %572 : vector<8x128xi1> to vector<8x128xi32>
    %574 = arith.sitofp %573 : vector<8x128xi32> to vector<8x128xf32>
    %575 = arith.addf %569, %574 : vector<8x128xf32>
    %576 = vector.extract_strided_slice %3 {offsets = [0, 95], sizes = [8, 1], strides = [1, 1]} : vector<8x128xi32> to vector<8x1xi32>
    %577 = vector.broadcast %576 : vector<8x1xi32> to vector<8x128xi32>
    %578 = arith.cmpi eq, %577, %4 : vector<8x128xi32>
    %579 = arith.extui %578 : vector<8x128xi1> to vector<8x128xi32>
    %580 = arith.sitofp %579 : vector<8x128xi32> to vector<8x128xf32>
    %581 = arith.addf %575, %580 : vector<8x128xf32>
    %582 = vector.extract_strided_slice %3 {offsets = [0, 96], sizes = [8, 1], strides = [1, 1]} : vector<8x128xi32> to vector<8x1xi32>
    %583 = vector.broadcast %582 : vector<8x1xi32> to vector<8x128xi32>
    %584 = arith.cmpi eq, %583, %4 : vector<8x128xi32>
    %585 = arith.extui %584 : vector<8x128xi1> to vector<8x128xi32>
    %586 = arith.sitofp %585 : vector<8x128xi32> to vector<8x128xf32>
    %587 = arith.addf %581, %586 : vector<8x128xf32>
    %588 = vector.extract_strided_slice %3 {offsets = [0, 97], sizes = [8, 1], strides = [1, 1]} : vector<8x128xi32> to vector<8x1xi32>
    %589 = vector.broadcast %588 : vector<8x1xi32> to vector<8x128xi32>
    %590 = arith.cmpi eq, %589, %4 : vector<8x128xi32>
    %591 = arith.extui %590 : vector<8x128xi1> to vector<8x128xi32>
    %592 = arith.sitofp %591 : vector<8x128xi32> to vector<8x128xf32>
    %593 = arith.addf %587, %592 : vector<8x128xf32>
    %594 = vector.extract_strided_slice %3 {offsets = [0, 98], sizes = [8, 1], strides = [1, 1]} : vector<8x128xi32> to vector<8x1xi32>
    %595 = vector.broadcast %594 : vector<8x1xi32> to vector<8x128xi32>
    %596 = arith.cmpi eq, %595, %4 : vector<8x128xi32>
    %597 = arith.extui %596 : vector<8x128xi1> to vector<8x128xi32>
    %598 = arith.sitofp %597 : vector<8x128xi32> to vector<8x128xf32>
    %599 = arith.addf %593, %598 : vector<8x128xf32>
    %600 = vector.extract_strided_slice %3 {offsets = [0, 99], sizes = [8, 1], strides = [1, 1]} : vector<8x128xi32> to vector<8x1xi32>
    %601 = vector.broadcast %600 : vector<8x1xi32> to vector<8x128xi32>
    %602 = arith.cmpi eq, %601, %4 : vector<8x128xi32>
    %603 = arith.extui %602 : vector<8x128xi1> to vector<8x128xi32>
    %604 = arith.sitofp %603 : vector<8x128xi32> to vector<8x128xf32>
    %605 = arith.addf %599, %604 : vector<8x128xf32>
    %606 = vector.extract_strided_slice %3 {offsets = [0, 100], sizes = [8, 1], strides = [1, 1]} : vector<8x128xi32> to vector<8x1xi32>
    %607 = vector.broadcast %606 : vector<8x1xi32> to vector<8x128xi32>
    %608 = arith.cmpi eq, %607, %4 : vector<8x128xi32>
    %609 = arith.extui %608 : vector<8x128xi1> to vector<8x128xi32>
    %610 = arith.sitofp %609 : vector<8x128xi32> to vector<8x128xf32>
    %611 = arith.addf %605, %610 : vector<8x128xf32>
    %612 = vector.extract_strided_slice %3 {offsets = [0, 101], sizes = [8, 1], strides = [1, 1]} : vector<8x128xi32> to vector<8x1xi32>
    %613 = vector.broadcast %612 : vector<8x1xi32> to vector<8x128xi32>
    %614 = arith.cmpi eq, %613, %4 : vector<8x128xi32>
    %615 = arith.extui %614 : vector<8x128xi1> to vector<8x128xi32>
    %616 = arith.sitofp %615 : vector<8x128xi32> to vector<8x128xf32>
    %617 = arith.addf %611, %616 : vector<8x128xf32>
    %618 = vector.extract_strided_slice %3 {offsets = [0, 102], sizes = [8, 1], strides = [1, 1]} : vector<8x128xi32> to vector<8x1xi32>
    %619 = vector.broadcast %618 : vector<8x1xi32> to vector<8x128xi32>
    %620 = arith.cmpi eq, %619, %4 : vector<8x128xi32>
    %621 = arith.extui %620 : vector<8x128xi1> to vector<8x128xi32>
    %622 = arith.sitofp %621 : vector<8x128xi32> to vector<8x128xf32>
    %623 = arith.addf %617, %622 : vector<8x128xf32>
    %624 = vector.extract_strided_slice %3 {offsets = [0, 103], sizes = [8, 1], strides = [1, 1]} : vector<8x128xi32> to vector<8x1xi32>
    %625 = vector.broadcast %624 : vector<8x1xi32> to vector<8x128xi32>
    %626 = arith.cmpi eq, %625, %4 : vector<8x128xi32>
    %627 = arith.extui %626 : vector<8x128xi1> to vector<8x128xi32>
    %628 = arith.sitofp %627 : vector<8x128xi32> to vector<8x128xf32>
    %629 = arith.addf %623, %628 : vector<8x128xf32>
    %630 = vector.extract_strided_slice %3 {offsets = [0, 104], sizes = [8, 1], strides = [1, 1]} : vector<8x128xi32> to vector<8x1xi32>
    %631 = vector.broadcast %630 : vector<8x1xi32> to vector<8x128xi32>
    %632 = arith.cmpi eq, %631, %4 : vector<8x128xi32>
    %633 = arith.extui %632 : vector<8x128xi1> to vector<8x128xi32>
    %634 = arith.sitofp %633 : vector<8x128xi32> to vector<8x128xf32>
    %635 = arith.addf %629, %634 : vector<8x128xf32>
    %636 = vector.extract_strided_slice %3 {offsets = [0, 105], sizes = [8, 1], strides = [1, 1]} : vector<8x128xi32> to vector<8x1xi32>
    %637 = vector.broadcast %636 : vector<8x1xi32> to vector<8x128xi32>
    %638 = arith.cmpi eq, %637, %4 : vector<8x128xi32>
    %639 = arith.extui %638 : vector<8x128xi1> to vector<8x128xi32>
    %640 = arith.sitofp %639 : vector<8x128xi32> to vector<8x128xf32>
    %641 = arith.addf %635, %640 : vector<8x128xf32>
    %642 = vector.extract_strided_slice %3 {offsets = [0, 106], sizes = [8, 1], strides = [1, 1]} : vector<8x128xi32> to vector<8x1xi32>
    %643 = vector.broadcast %642 : vector<8x1xi32> to vector<8x128xi32>
    %644 = arith.cmpi eq, %643, %4 : vector<8x128xi32>
    %645 = arith.extui %644 : vector<8x128xi1> to vector<8x128xi32>
    %646 = arith.sitofp %645 : vector<8x128xi32> to vector<8x128xf32>
    %647 = arith.addf %641, %646 : vector<8x128xf32>
    %648 = vector.extract_strided_slice %3 {offsets = [0, 107], sizes = [8, 1], strides = [1, 1]} : vector<8x128xi32> to vector<8x1xi32>
    %649 = vector.broadcast %648 : vector<8x1xi32> to vector<8x128xi32>
    %650 = arith.cmpi eq, %649, %4 : vector<8x128xi32>
    %651 = arith.extui %650 : vector<8x128xi1> to vector<8x128xi32>
    %652 = arith.sitofp %651 : vector<8x128xi32> to vector<8x128xf32>
    %653 = arith.addf %647, %652 : vector<8x128xf32>
    %654 = vector.extract_strided_slice %3 {offsets = [0, 108], sizes = [8, 1], strides = [1, 1]} : vector<8x128xi32> to vector<8x1xi32>
    %655 = vector.broadcast %654 : vector<8x1xi32> to vector<8x128xi32>
    %656 = arith.cmpi eq, %655, %4 : vector<8x128xi32>
    %657 = arith.extui %656 : vector<8x128xi1> to vector<8x128xi32>
    %658 = arith.sitofp %657 : vector<8x128xi32> to vector<8x128xf32>
    %659 = arith.addf %653, %658 : vector<8x128xf32>
    %660 = vector.extract_strided_slice %3 {offsets = [0, 109], sizes = [8, 1], strides = [1, 1]} : vector<8x128xi32> to vector<8x1xi32>
    %661 = vector.broadcast %660 : vector<8x1xi32> to vector<8x128xi32>
    %662 = arith.cmpi eq, %661, %4 : vector<8x128xi32>
    %663 = arith.extui %662 : vector<8x128xi1> to vector<8x128xi32>
    %664 = arith.sitofp %663 : vector<8x128xi32> to vector<8x128xf32>
    %665 = arith.addf %659, %664 : vector<8x128xf32>
    %666 = vector.extract_strided_slice %3 {offsets = [0, 110], sizes = [8, 1], strides = [1, 1]} : vector<8x128xi32> to vector<8x1xi32>
    %667 = vector.broadcast %666 : vector<8x1xi32> to vector<8x128xi32>
    %668 = arith.cmpi eq, %667, %4 : vector<8x128xi32>
    %669 = arith.extui %668 : vector<8x128xi1> to vector<8x128xi32>
    %670 = arith.sitofp %669 : vector<8x128xi32> to vector<8x128xf32>
    %671 = arith.addf %665, %670 : vector<8x128xf32>
    %672 = vector.extract_strided_slice %3 {offsets = [0, 111], sizes = [8, 1], strides = [1, 1]} : vector<8x128xi32> to vector<8x1xi32>
    %673 = vector.broadcast %672 : vector<8x1xi32> to vector<8x128xi32>
    %674 = arith.cmpi eq, %673, %4 : vector<8x128xi32>
    %675 = arith.extui %674 : vector<8x128xi1> to vector<8x128xi32>
    %676 = arith.sitofp %675 : vector<8x128xi32> to vector<8x128xf32>
    %677 = arith.addf %671, %676 : vector<8x128xf32>
    %678 = vector.extract_strided_slice %3 {offsets = [0, 112], sizes = [8, 1], strides = [1, 1]} : vector<8x128xi32> to vector<8x1xi32>
    %679 = vector.broadcast %678 : vector<8x1xi32> to vector<8x128xi32>
    %680 = arith.cmpi eq, %679, %4 : vector<8x128xi32>
    %681 = arith.extui %680 : vector<8x128xi1> to vector<8x128xi32>
    %682 = arith.sitofp %681 : vector<8x128xi32> to vector<8x128xf32>
    %683 = arith.addf %677, %682 : vector<8x128xf32>
    %684 = vector.extract_strided_slice %3 {offsets = [0, 113], sizes = [8, 1], strides = [1, 1]} : vector<8x128xi32> to vector<8x1xi32>
    %685 = vector.broadcast %684 : vector<8x1xi32> to vector<8x128xi32>
    %686 = arith.cmpi eq, %685, %4 : vector<8x128xi32>
    %687 = arith.extui %686 : vector<8x128xi1> to vector<8x128xi32>
    %688 = arith.sitofp %687 : vector<8x128xi32> to vector<8x128xf32>
    %689 = arith.addf %683, %688 : vector<8x128xf32>
    %690 = vector.extract_strided_slice %3 {offsets = [0, 114], sizes = [8, 1], strides = [1, 1]} : vector<8x128xi32> to vector<8x1xi32>
    %691 = vector.broadcast %690 : vector<8x1xi32> to vector<8x128xi32>
    %692 = arith.cmpi eq, %691, %4 : vector<8x128xi32>
    %693 = arith.extui %692 : vector<8x128xi1> to vector<8x128xi32>
    %694 = arith.sitofp %693 : vector<8x128xi32> to vector<8x128xf32>
    %695 = arith.addf %689, %694 : vector<8x128xf32>
    %696 = vector.extract_strided_slice %3 {offsets = [0, 115], sizes = [8, 1], strides = [1, 1]} : vector<8x128xi32> to vector<8x1xi32>
    %697 = vector.broadcast %696 : vector<8x1xi32> to vector<8x128xi32>
    %698 = arith.cmpi eq, %697, %4 : vector<8x128xi32>
    %699 = arith.extui %698 : vector<8x128xi1> to vector<8x128xi32>
    %700 = arith.sitofp %699 : vector<8x128xi32> to vector<8x128xf32>
    %701 = arith.addf %695, %700 : vector<8x128xf32>
    %702 = vector.extract_strided_slice %3 {offsets = [0, 116], sizes = [8, 1], strides = [1, 1]} : vector<8x128xi32> to vector<8x1xi32>
    %703 = vector.broadcast %702 : vector<8x1xi32> to vector<8x128xi32>
    %704 = arith.cmpi eq, %703, %4 : vector<8x128xi32>
    %705 = arith.extui %704 : vector<8x128xi1> to vector<8x128xi32>
    %706 = arith.sitofp %705 : vector<8x128xi32> to vector<8x128xf32>
    %707 = arith.addf %701, %706 : vector<8x128xf32>
    %708 = vector.extract_strided_slice %3 {offsets = [0, 117], sizes = [8, 1], strides = [1, 1]} : vector<8x128xi32> to vector<8x1xi32>
    %709 = vector.broadcast %708 : vector<8x1xi32> to vector<8x128xi32>
    %710 = arith.cmpi eq, %709, %4 : vector<8x128xi32>
    %711 = arith.extui %710 : vector<8x128xi1> to vector<8x128xi32>
    %712 = arith.sitofp %711 : vector<8x128xi32> to vector<8x128xf32>
    %713 = arith.addf %707, %712 : vector<8x128xf32>
    %714 = vector.extract_strided_slice %3 {offsets = [0, 118], sizes = [8, 1], strides = [1, 1]} : vector<8x128xi32> to vector<8x1xi32>
    %715 = vector.broadcast %714 : vector<8x1xi32> to vector<8x128xi32>
    %716 = arith.cmpi eq, %715, %4 : vector<8x128xi32>
    %717 = arith.extui %716 : vector<8x128xi1> to vector<8x128xi32>
    %718 = arith.sitofp %717 : vector<8x128xi32> to vector<8x128xf32>
    %719 = arith.addf %713, %718 : vector<8x128xf32>
    %720 = vector.extract_strided_slice %3 {offsets = [0, 119], sizes = [8, 1], strides = [1, 1]} : vector<8x128xi32> to vector<8x1xi32>
    %721 = vector.broadcast %720 : vector<8x1xi32> to vector<8x128xi32>
    %722 = arith.cmpi eq, %721, %4 : vector<8x128xi32>
    %723 = arith.extui %722 : vector<8x128xi1> to vector<8x128xi32>
    %724 = arith.sitofp %723 : vector<8x128xi32> to vector<8x128xf32>
    %725 = arith.addf %719, %724 : vector<8x128xf32>
    %726 = vector.extract_strided_slice %3 {offsets = [0, 120], sizes = [8, 1], strides = [1, 1]} : vector<8x128xi32> to vector<8x1xi32>
    %727 = vector.broadcast %726 : vector<8x1xi32> to vector<8x128xi32>
    %728 = arith.cmpi eq, %727, %4 : vector<8x128xi32>
    %729 = arith.extui %728 : vector<8x128xi1> to vector<8x128xi32>
    %730 = arith.sitofp %729 : vector<8x128xi32> to vector<8x128xf32>
    %731 = arith.addf %725, %730 : vector<8x128xf32>
    %732 = vector.extract_strided_slice %3 {offsets = [0, 121], sizes = [8, 1], strides = [1, 1]} : vector<8x128xi32> to vector<8x1xi32>
    %733 = vector.broadcast %732 : vector<8x1xi32> to vector<8x128xi32>
    %734 = arith.cmpi eq, %733, %4 : vector<8x128xi32>
    %735 = arith.extui %734 : vector<8x128xi1> to vector<8x128xi32>
    %736 = arith.sitofp %735 : vector<8x128xi32> to vector<8x128xf32>
    %737 = arith.addf %731, %736 : vector<8x128xf32>
    %738 = vector.extract_strided_slice %3 {offsets = [0, 122], sizes = [8, 1], strides = [1, 1]} : vector<8x128xi32> to vector<8x1xi32>
    %739 = vector.broadcast %738 : vector<8x1xi32> to vector<8x128xi32>
    %740 = arith.cmpi eq, %739, %4 : vector<8x128xi32>
    %741 = arith.extui %740 : vector<8x128xi1> to vector<8x128xi32>
    %742 = arith.sitofp %741 : vector<8x128xi32> to vector<8x128xf32>
    %743 = arith.addf %737, %742 : vector<8x128xf32>
    %744 = vector.extract_strided_slice %3 {offsets = [0, 123], sizes = [8, 1], strides = [1, 1]} : vector<8x128xi32> to vector<8x1xi32>
    %745 = vector.broadcast %744 : vector<8x1xi32> to vector<8x128xi32>
    %746 = arith.cmpi eq, %745, %4 : vector<8x128xi32>
    %747 = arith.extui %746 : vector<8x128xi1> to vector<8x128xi32>
    %748 = arith.sitofp %747 : vector<8x128xi32> to vector<8x128xf32>
    %749 = arith.addf %743, %748 : vector<8x128xf32>
    %750 = vector.extract_strided_slice %3 {offsets = [0, 124], sizes = [8, 1], strides = [1, 1]} : vector<8x128xi32> to vector<8x1xi32>
    %751 = vector.broadcast %750 : vector<8x1xi32> to vector<8x128xi32>
    %752 = arith.cmpi eq, %751, %4 : vector<8x128xi32>
    %753 = arith.extui %752 : vector<8x128xi1> to vector<8x128xi32>
    %754 = arith.sitofp %753 : vector<8x128xi32> to vector<8x128xf32>
    %755 = arith.addf %749, %754 : vector<8x128xf32>
    %756 = vector.extract_strided_slice %3 {offsets = [0, 125], sizes = [8, 1], strides = [1, 1]} : vector<8x128xi32> to vector<8x1xi32>
    %757 = vector.broadcast %756 : vector<8x1xi32> to vector<8x128xi32>
    %758 = arith.cmpi eq, %757, %4 : vector<8x128xi32>
    %759 = arith.extui %758 : vector<8x128xi1> to vector<8x128xi32>
    %760 = arith.sitofp %759 : vector<8x128xi32> to vector<8x128xf32>
    %761 = arith.addf %755, %760 : vector<8x128xf32>
    %762 = vector.extract_strided_slice %3 {offsets = [0, 126], sizes = [8, 1], strides = [1, 1]} : vector<8x128xi32> to vector<8x1xi32>
    %763 = vector.broadcast %762 : vector<8x1xi32> to vector<8x128xi32>
    %764 = arith.cmpi eq, %763, %4 : vector<8x128xi32>
    %765 = arith.extui %764 : vector<8x128xi1> to vector<8x128xi32>
    %766 = arith.sitofp %765 : vector<8x128xi32> to vector<8x128xf32>
    %767 = arith.addf %761, %766 : vector<8x128xf32>
    %768 = vector.extract_strided_slice %3 {offsets = [0, 127], sizes = [8, 1], strides = [1, 1]} : vector<8x128xi32> to vector<8x1xi32>
    %769 = vector.broadcast %768 : vector<8x1xi32> to vector<8x128xi32>
    %770 = arith.cmpi eq, %769, %4 : vector<8x128xi32>
    %771 = arith.extui %770 : vector<8x128xi1> to vector<8x128xi32>
    %772 = arith.sitofp %771 : vector<8x128xi32> to vector<8x128xf32>
    %773 = arith.addf %767, %772 : vector<8x128xf32>
    %c0_2 = arith.constant 0 : index
    %c0_3 = arith.constant 0 : index
    %774 = vector.load %arg8[%c0_2, %c0_3] : memref<8x128xf32, #tpu.memory_space<vmem>>, vector<8x128xf32>
    %775 = arith.addf %774, %773 : vector<8x128xf32>
    %c0_4 = arith.constant 0 : index
    %c0_5 = arith.constant 0 : index
    %776 = vector.load %arg8[%c0_4, %c0_5] : memref<8x128xf32, #tpu.memory_space<vmem>>, vector<8x128xf32>
    tpu.vector_store %arg8[%c0_4, %c0_5], %775 {strides = array<i32>} : memref<8x128xf32, #tpu.memory_space<vmem>>, vector<8x128xf32>,
    %c0_i32_6 = arith.constant 0 : i32
    %777 = arith.cmpi eq, %arg1, %c0_i32_6 : i32
    %778 = arith.extui %777 : i1 to i32
    %c0_i32_7 = arith.constant 0 : i32
    %779 = arith.cmpi ne, %778, %c0_i32_7 : i32
    scf.if %779 {
      %c0_8 = arith.constant 0 : index
      %c0_9 = arith.constant 0 : index
      %780 = vector.load %arg8[%c0_8, %c0_9] : memref<8x128xf32, #tpu.memory_space<vmem>>, vector<8x128xf32>
      %c0_10 = arith.constant 0 : index
      %c0_11 = arith.constant 0 : index
      %781 = vector.load %arg3[%c0_10, %c0_11] : memref<128x128xf32, #tpu.memory_space<vmem>>, vector<128x128xf32>
      %cst_12 = arith.constant dense<0.000000e+00> : vector<8x128xf32>
      %782 = tpu.matmul %780, %781, %cst_12 {dimension_numbers = #tpu.dot_dimension_numbers<[1], [0], [0], [1], [0, 0, 1, 1], [], []>} : vector<8x128xf32>, vector<128x128xf32>, vector<8x128xf32> -> vector<8x128xf32>
      %783 = tpu.iota {dimensions = array<i32: 1>} : vector<8x128xi32>
      %c0_i32_13 = arith.constant 0 : i32
      %784 = vector.broadcast %c0_i32_13 : i32 to vector<8x128xi32>
      %785 = arith.cmpi sgt, %783, %784 : vector<8x128xi32>
      %cst_14 = arith.constant 0.000000e+00 : f32
      %786 = vector.broadcast %cst_14 : f32 to vector<8x128xf32>
      %787 = arith.select %785, %780, %786 : vector<8x128xi1>, vector<8x128xf32>
      %cst_15 = arith.constant dense<0.000000e+00> : vector<8xf32>
      %788 = vector.multi_reduction <add>, %787, %cst_15 [1] : vector<8x128xf32> to vector<8xf32>
      %789 = vector.shape_cast %788 : vector<8xf32> to vector<8x1xf32>
      %cst_16 = arith.constant 1.000000e+00 : f32
      %790 = vector.broadcast %cst_16 : f32 to vector<8x1xf32>
      %791 = arith.maximumf %789, %790 : vector<8x1xf32>
      %792 = tpu.reciprocal %791 : vector<8x1xf32> -> vector<8x1xf32>
      %793 = vector.broadcast %792 : vector<8x1xf32> to vector<8x128xf32>
      %794 = arith.mulf %782, %793 : vector<8x128xf32>
      %c0_17 = arith.constant 0 : index
      %c0_18 = arith.constant 0 : index
      %795 = vector.load %arg7[%c0_17, %c0_18] : memref<8x128xf32, #tpu.memory_space<vmem>>, vector<8x128xf32>
      tpu.vector_store %arg7[%c0_17, %c0_18], %794 {strides = array<i32>} : memref<8x128xf32, #tpu.memory_space<vmem>>, vector<8x128xf32>,
      %c0_19 = arith.constant 0 : index
      %c0_20 = arith.constant 0 : index
      %796 = vector.load %arg4[%c0_19, %c0_20] : memref<128x128xf32, #tpu.memory_space<vmem>>, vector<128x128xf32>
      %cst_21 = arith.constant dense<0.000000e+00> : vector<8x128xf32>
      %797 = tpu.matmul %794, %796, %cst_21 {dimension_numbers = #tpu.dot_dimension_numbers<[1], [0], [0], [1], [0, 0, 1, 1], [], []>} : vector<8x128xf32>, vector<128x128xf32>, vector<8x128xf32> -> vector<8x128xf32>
      %c0_22 = arith.constant 0 : index
      %c0_23 = arith.constant 0 : index
      %798 = vector.load %arg5[%c0_22, %c0_23] : memref<1x128xf32, #tpu.memory_space<vmem>>, vector<1x128xf32>
      %799 = vector.broadcast %798 : vector<1x128xf32> to vector<8x128xf32>
      %800 = arith.addf %797, %799 : vector<8x128xf32>
      %c0_24 = arith.constant 0 : index
      %c0_25 = arith.constant 0 : index
      %801 = vector.load %arg6[%c0_24, %c0_25] : memref<8x128xf32, #tpu.memory_space<vmem>>, vector<8x128xf32>
      tpu.vector_store %arg6[%c0_24, %c0_25], %800 {strides = array<i32>} : memref<8x128xf32, #tpu.memory_space<vmem>>, vector<8x128xf32>,
    } else {
    }
    return
  }
  func.func @transform_0(%arg0: i32, %arg1: i32) -> (i32, i32) {
    %c0_i32 = arith.constant 0 : i32
    return %arg0, %arg1 : i32, i32
  }
  func.func @transform_1(%arg0: i32, %arg1: i32) -> (i32, i32) {
    %c0_i32 = arith.constant 0 : i32
    %c0_i32_0 = arith.constant 0 : i32
    %c0_i32_1 = arith.constant 0 : i32
    return %c0_i32, %c0_i32_0 : i32, i32
  }
  func.func @transform_2(%arg0: i32, %arg1: i32) -> (i32, i32) {
    %c0_i32 = arith.constant 0 : i32
    %c0_i32_0 = arith.constant 0 : i32
    %c0_i32_1 = arith.constant 0 : i32
    return %c0_i32, %c0_i32_0 : i32, i32
  }
  func.func @transform_3(%arg0: i32, %arg1: i32) -> (i32, i32) {
    %c0_i32 = arith.constant 0 : i32
    %c0_i32_0 = arith.constant 0 : i32
    %c0_i32_1 = arith.constant 0 : i32
    return %c0_i32, %c0_i32_0 : i32, i32
  }
  func.func @transform_4(%arg0: i32, %arg1: i32) -> (i32, i32) {
    %c0_i32 = arith.constant 0 : i32
    %c0_i32_0 = arith.constant 0 : i32
    return %arg0, %c0_i32 : i32, i32
  }
  func.func @transform_5(%arg0: i32, %arg1: i32) -> (i32, i32) {
    %c0_i32 = arith.constant 0 : i32
    %c0_i32_0 = arith.constant 0 : i32
    return %arg0, %c0_i32 : i32, i32
  }
}

</mosaic_0001>

<bundles_post_ra>
// kernel: tpu_custom_call.1
= control target key start
LH: loop header
LB: loop body
LE: loop exit
PB: predicated region body
PF: predicated region fallthrough
CT: control target
= control target key end

     0   :  { %11 = vsyncpa [#allocation4], 0  ;;  %s2233_s0 = inlined_call_operand.hbm [shape: s32[8,128], index: 0, kind: input, shape index: {}]   ;;  %s2234_s1 = inlined_call_operand.hbm [shape: f32[128,128], index: 1, kind: input, shape index: {}]   ;;  %s2235_s2 = inlined_call_operand.hbm [shape: f32[128,128], index: 2, kind: input, shape index: {}]   ;;  %s2236_s3 = inlined_call_operand.vmem [shape: f32[1,128], index: 3, kind: input, shape index: {}]   ;;  %s2237_s4 = inlined_call_operand.hbm [shape: f32[8,128], index: 4, kind: output, shape index: {0}]   ;;  %s2238_s5 = inlined_call_operand.hbm [shape: f32[8,128], index: 5, kind: output, shape index: {1}]  }
   0x1   :  { %12 = vsyncpa [#allocation7], 0 }
   0x2   :  { %13 = vsyncpa [#allocation5], 0  ;;  %s30_s20 = sshll.u32 %s2234_s1, 4  ;;  %s31_s20 = int_to_ptr.hbm [resolvable:$true] %s30_s20 }
   0x3   :  { %14 = vsyncpa [#allocation11], 0  ;;  %s1634_s21 = smov [#allocation6]   ;;  %s20_s25 = sshll.u32 %s2233_s0, 4  ;;  %s21_s25 = int_to_ptr.hbm [resolvable:$true] %s20_s25 }
   0x4   :  { %s32_s22 = sshll.u32 %s1634_s21, 4  ;;  %s1635_s26 = smov 128   ;;  %s33_s22 = int_to_ptr.vmem [resolvable:$true] %s32_s22 }
   0x5   :  { %s1636_s27 = smov 8   ;;  %s1637_s28 = smov [#allocation3]  }
   0x6   :  { %38 = dma.hbm_to_vmem [thread:$0]  %s31_s20, 2048, %s33_s22, [#allocation7], %s1635_s26, %s1635_s26, %s1636_s27  }
   0x7   :  { %s22_s29 = sshll.u32 %s1637_s28, 4  ;;  %s43_s7 = sshll.u32 %s2235_s2, 4  ;;  %s23_s29 = int_to_ptr.vmem [resolvable:$true] %s22_s29  ;;  %s44_s7 = int_to_ptr.hbm [resolvable:$true] %s43_s7 }
   0x8   :  { %25 = dma.hbm_to_vmem [thread:$0]  %s21_s25, 128, %s23_s29, [#allocation4]  }
   0x9   :  { %s1638_s1 = smov [#allocation8]  }
   0xa   :  { %s45_s8 = sshll.u32 %s1638_s1, 4  ;;  %s46_s8 = int_to_ptr.vmem [resolvable:$true] %s45_s8 }
   0xb   :  { %51 = dma.hbm_to_vmem [thread:$0]  %s44_s7, 2048, %s46_s8, [#allocation7], %s1635_s26, %s1635_s26, %s1636_s27  }
   0xc   :  { %1626 = dma.done.wait [#allocation4], 128  }
   0xd   :  { %1627 = vsyncadd [#allocation4], 4294967168 }
   0xe   :  { %1628 = dma.done.wait [#allocation7], 4096  }
   0xf   :  { %1629 = vsyncadd [#allocation7], 4294963200  ;;  %v1639_v0 = vmov 2   ;;  %v1640_v1 = vmov 0   ;;  %v1641_v2 = vmov 4   ;;  %v1809_v3 = vld [vmem:[#allocation3] sm:$0xff]  ;;  %v72_v39 = vlaneseq }
  0x10   :  { %1375 = vset.pattern.permute.xlu1 %v1639_v0  ;;  %1373 = vset.pattern.permute.xlu0 %v1640_v1  ;;  %v1642_v4 = vmov 3   ;;  %v1643_v5 = vmov 1   ;;  %v1644_v6 = vmov 5   ;;  %v1645_v7 = vmov 6   ;;  %s1768_s0 = smov [#allocation10]   ;;  %s1093_s11 = sshll.u32 %s2238_s5, 4  ;;  %s1094_s11 = int_to_ptr.hbm [resolvable:$true] %s1093_s11 }
  0x11   :  { %1377 = vset.pattern.permute.xlu2 %v1641_v2  ;;  %89 = vperm.xlu1 %1375, %v1809_v3   ;;  %v1646_v8 = vmov 8   ;;  %v1647_v9 = vmov 7   ;;  %v1648_v10 = vmov 9   ;;  %v1649_v11 = vmov 13   ;;  %s1091_s2 = sshll.u32 %s1768_s0, 4  ;;  %s1769_s14 = smov [#allocation9]   ;;  %s1092_s2 = int_to_ptr.vmem [resolvable:$true] %s1091_s2 }
  0x12   :  { %75 = vperm.xlu0 %1373, %v1809_v3   ;;  %103 = vperm.xlu2 %1377, %v1809_v3   ;;  %v1650_v12 = vmov 10   ;;  %v1651_v13 = vmov 11   ;;  %v1652_v14 = vmov 18   ;;  %v1653_v15 = vmov 12   ;;  %s1080_s15 = sshll.u32 %s1769_s14, 4  ;;  %s1082_s18 = sshll.u32 %s2237_s4, 4  ;;  %s1081_s15 = int_to_ptr.vmem [resolvable:$true] %s1080_s15  ;;  %s1083_s18 = int_to_ptr.hbm [resolvable:$true] %s1082_s18 }
  0x13   :  { %v1654_v16 = vmov 14   ;;  %v1655_v17 = vmov 23   ;;  %v1656_v18 = vmov 15   ;;  %v1657_v19 = vmov 16  }
  0x14   :  { %v1658_v20 = vmov 17   ;;  %v1659_v21 = vmov 28   ;;  %v1660_v22 = vmov 19   ;;  %v1661_v23 = vmov 20  }
  0x15   :  { %v1662_v24 = vmov 21   ;;  %v1663_v25 = vmov 22   ;;  %v1664_v26 = vmov 33   ;;  %v1665_v27 = vmov 24  }
  0x16   :  { %v1666_v28 = vmov 25   ;;  %v1667_v29 = vmov 26   ;;  %v1668_v30 = vmov 27   ;;  %v1669_v32 = vmov 38  }
  0x17   :  { %v1670_v33 = vmov 29   ;;  %v1671_v34 = vmov 30   ;;  %v1672_v36 = vmov 31   ;;  %v1673_v37 = vmov 32  }
  0x18   :  { %v1674_v42 = vmov 43   ;;  %v1675_v43 = vmov 34   ;;  %v1848_v44 = vand.u32 127, %v72_v39  ;;  %v1676_v45 = vmov 35  }
  0x19   :  { %1376 = vset.pattern.permute.xlu1 %v1642_v4  ;;  %v1677_v47 = vmov 0.0   ;;  %v1678_v52 = vmov 36   ;;  %v1679_v55 = vmov 37   ;;  %v1680_v1 = vmov 48  }
  0x1a   :  { %1374 = vset.pattern.permute.xlu0 %v1643_v5  ;;  %96 = vperm.xlu1 %1376, %v1809_v3   ;;  %v1681_v5 = vmov 39  }
  0x1b   :  { %82 = vperm.xlu0 %1374, %v1809_v3   ;;  %1378 = vset.pattern.permute.xlu2 %v1644_v6 }
  0x1c   :  { %110 = vperm.xlu2 %1378, %v1809_v3  }
  0x22   :  { %1379 = vset.pattern.permute.xlu1 %v1645_v7 }
  0x23   :  { %1381 = vset.pattern.permute.xlu0 %v1646_v8  ;;  %117 = vperm.xlu1 %1379, %v1809_v3   ;;  %v1682_v8 = vmov 40  }
  0x24   :  { %131 = vperm.xlu0 %1381, %v1809_v3   ;;  %1380 = vset.pattern.permute.xlu2 %v1647_v9 }
  0x25   :  { %124 = vperm.xlu2 %1380, %v1809_v3  }
  0x2b   :  { %1382 = vset.pattern.permute.xlu1 %v1648_v10 }
  0x2c   :  { %1386 = vset.pattern.permute.xlu0 %v1649_v11  ;;  %138 = vperm.xlu1 %1382, %v1809_v3  }
  0x2d   :  { %166 = vperm.xlu0 %1386, %v1809_v3   ;;  %1383 = vset.pattern.permute.xlu2 %v1650_v12 }
  0x2e   :  { %145 = vperm.xlu2 %1383, %v1809_v3  }
  0x34   :  { %1384 = vset.pattern.permute.xlu1 %v1651_v13 }
  0x35   :  { %1391 = vset.pattern.permute.xlu0 %v1652_v14  ;;  %152 = vperm.xlu1 %1384, %v1809_v3  }
  0x36   :  { %201 = vperm.xlu0 %1391, %v1809_v3   ;;  %1385 = vset.pattern.permute.xlu2 %v1653_v15 }
  0x37   :  { %159 = vperm.xlu2 %1385, %v1809_v3  }
  0x3d   :  { %1387 = vset.pattern.permute.xlu1 %v1654_v16  ;;  %v1683_v16 = vmov 41  }
  0x3e   :  { %1396 = vset.pattern.permute.xlu0 %v1655_v17  ;;  %173 = vperm.xlu1 %1387, %v1809_v3  }
  0x3f   :  { %236 = vperm.xlu0 %1396, %v1809_v3   ;;  %1388 = vset.pattern.permute.xlu2 %v1656_v18  ;;  %v1684_v18 = vmov 42  }
  0x40   :  { %180 = vperm.xlu2 %1388, %v1809_v3  }
  0x46   :  { %1389 = vset.pattern.permute.xlu1 %v1657_v19 }
  0x47   :  { %187 = vperm.xlu1 %1389, %v1809_v3   ;;  %1401 = vset.pattern.permute.xlu0 %v1659_v21 }
  0x48   :  { %1390 = vset.pattern.permute.xlu2 %v1658_v20  ;;  %271 = vperm.xlu0 %1401, %v1809_v3  }
  0x49   :  { %194 = vperm.xlu2 %1390, %v1809_v3  }
  0x4f   :  { %1392 = vset.pattern.permute.xlu1 %v1660_v22 }
  0x50   :  { %208 = vperm.xlu1 %1392, %v1809_v3   ;;  %1406 = vset.pattern.permute.xlu0 %v1664_v26  ;;  %v1686_v26 = vmov 44  }
  0x51   :  { %1393 = vset.pattern.permute.xlu2 %v1661_v23  ;;  %306 = vperm.xlu0 %1406, %v1809_v3   ;;  %v1685_v23 = vmov 53  }
  0x52   :  { %215 = vperm.xlu2 %1393, %v1809_v3  }
  0x58   :  { %1394 = vset.pattern.permute.xlu1 %v1662_v24 }
  0x59   :  { %222 = vperm.xlu1 %1394, %v1809_v3   ;;  %1411 = vset.pattern.permute.xlu0 %v1669_v32 }
  0x5a   :  { %1395 = vset.pattern.permute.xlu2 %v1663_v25  ;;  %341 = vperm.xlu0 %1411, %v1809_v3  }
  0x5b   :  { %229 = vperm.xlu2 %1395, %v1809_v3  }
  0x61   :  { %1397 = vset.pattern.permute.xlu1 %v1665_v27 }
  0x62   :  { %243 = vperm.xlu1 %1397, %v1809_v3   ;;  %1416 = vset.pattern.permute.xlu0 %v1674_v42 }
  0x63   :  { %1398 = vset.pattern.permute.xlu2 %v1666_v28  ;;  %376 = vperm.xlu0 %1416, %v1809_v3   ;;  %v1687_v28 = vmov 45  }
  0x64   :  { %250 = vperm.xlu2 %1398, %v1809_v3  }
  0x6a   :  { %1399 = vset.pattern.permute.xlu1 %v1667_v29 }
  0x6b   :  { %257 = vperm.xlu1 %1399, %v1809_v3   ;;  %1421 = vset.pattern.permute.xlu0 %v1680_v1  ;;  %v1695_v1 = vmov 63  }
  0x6c   :  { %1400 = vset.pattern.permute.xlu2 %v1668_v30  ;;  %v104_v31 = vpop.permute.xlu2 %103  ;;  %411 = vperm.xlu0 %1421, %v1809_v3  }
  0x6d   :  { %264 = vperm.xlu2 %1400, %v1809_v3   ;;  %vm105_vm4 = vcmp.eq.s32.totalorder %v104_v31, %v1848_v44 }
  0x6e   :  { %v1113_v60 = vsel %vm105_vm4, 1.0, %v1677_v47 }
  0x73   :  { %1402 = vset.pattern.permute.xlu1 %v1670_v33 }
  0x74   :  { %278 = vperm.xlu1 %1402, %v1809_v3   ;;  %1426 = vset.pattern.permute.xlu0 %v1685_v23 }
  0x75   :  { %1403 = vset.pattern.permute.xlu2 %v1671_v34  ;;  %446 = vperm.xlu0 %1426, %v1809_v3  }
  0x76   :  { %285 = vperm.xlu2 %1403, %v1809_v3   ;;  %v111_v35 = vpop.permute.xlu2 %110 }
  0x77   :  { %vm112_vm5 = vcmp.eq.s32.totalorder %v111_v35, %v1848_v44 }
  0x78   :  { %v1114_v63 = vsel %vm112_vm5, 1.0, %v1677_v47 }
  0x7c   :  { %1404 = vset.pattern.permute.xlu1 %v1672_v36  ;;  %v1688_v36 = vmov 46  }
  0x7d   :  { %292 = vperm.xlu1 %1404, %v1809_v3  }
  0x7e   :  { %1405 = vset.pattern.permute.xlu2 %v1673_v37 }
  0x7f   :  { %299 = vperm.xlu2 %1405, %v1809_v3   ;;  %v125_v38 = vpop.permute.xlu2 %124 }
  0x80   :  { %vm126_vm6 = vcmp.eq.s32.totalorder %v125_v38, %v1848_v44  ;;  %v1689_v38 = vmov 47  }
  0x81   :  { %v1116_v6 = vsel %vm126_vm6, 1.0, %v1677_v47 }
  0x83   :  { %v90_v40 = vpop.permute.xlu1 %89 }
  0x84   :  { %v76_v41 = vpop.permute.xlu0 %75  ;;  %vm91_vm1 = vcmp.eq.s32.totalorder %v90_v40, %v1848_v44 }
  0x85   :  { %1407 = vset.pattern.permute.xlu1 %v1675_v43  ;;  %vm77_vm0 = vcmp.eq.s32.totalorder %v76_v41, %v1848_v44  ;;  %v1111_v54 = vsel %vm91_vm1, 1.0, %v1677_v47  ;;  %v1690_v43 = vmov 58  }
  0x86   :  { %313 = vperm.xlu1 %1407, %v1809_v3   ;;  %v1109_v48 = vsel %vm77_vm0, 1.0, %v1677_v47  ;;  %1431 = vset.pattern.permute.xlu0 %v1690_v43 }
  0x87   :  { %1408 = vset.pattern.permute.xlu2 %v1676_v45  ;;  %481 = vperm.xlu0 %1431, %v1809_v3  }
  0x88   :  { %320 = vperm.xlu2 %1408, %v1809_v3   ;;  %v146_v46 = vpop.permute.xlu2 %145 }
  0x89   :  { %vm147_vm9 = vcmp.eq.s32.totalorder %v146_v46, %v1848_v44 }
  0x8a   :  { %v1119_v15 = vsel %vm147_vm9, 1.0, %v1677_v47 }
  0x8c   :  { %v97_v49 = vpop.permute.xlu1 %96 }
  0x8d   :  { %v83_v50 = vpop.permute.xlu0 %82  ;;  %vm98_vm3 = vcmp.eq.s32.totalorder %v97_v49, %v1848_v44 }
  0x8e   :  { %vm84_vm2 = vcmp.eq.s32.totalorder %v83_v50, %v1848_v44  ;;  %1409 = vset.pattern.permute.xlu1 %v1678_v52  ;;  %v1112_v58 = vsel %vm98_vm3, 1.0, %v1677_v47  ;;  %v1692_v50 = vmov 50  }
  0x8f   :  { %v1110_v51 = vsel %vm84_vm2, 1.0, %v1677_v47  ;;  %327 = vperm.xlu1 %1409, %v1809_v3   ;;  %1436 = vset.pattern.permute.xlu0 %v1695_v1 }
  0x90   :  { %v87_v53 = vadd.f32 %v1110_v51, %v1109_v48  ;;  %1410 = vset.pattern.permute.xlu2 %v1679_v55  ;;  %v1691_v48 = vmov 49   ;;  %516 = vperm.xlu0 %1436, %v1809_v3  }
  0x91   :  { %334 = vperm.xlu2 %1410, %v1809_v3   ;;  %v160_v57 = vpop.permute.xlu2 %159 }
  0x92   :  { %v94_v56 = vadd.f32 %v1111_v54, %v87_v53  ;;  %vm161_vm11 = vcmp.eq.s32.totalorder %v160_v57, %v1848_v44 }
  0x93   :  { %v1121_v25 = vsel %vm161_vm11, 1.0, %v1677_v47 }
  0x94   :  { %v101_v59 = vadd.f32 %v1112_v58, %v94_v56  ;;  %v1693_v58 = vmov 51  }
  0x95   :  { %v118_v62 = vpop.permute.xlu1 %117 }
  0x96   :  { %v108_v61 = vadd.f32 %v1113_v60, %v101_v59  ;;  %vm119_vm7 = vcmp.eq.s32.totalorder %v118_v62, %v1848_v44  ;;  %v132_v0 = vpop.permute.xlu0 %131  ;;  %v1694_v60 = vmov 52  }
  0x97   :  { %v1115_v4 = vsel %vm119_vm7, 1.0, %v1677_v47  ;;  %1412 = vset.pattern.permute.xlu1 %v1681_v5  ;;  %vm133_vm8 = vcmp.eq.s32.totalorder %v132_v0, %v1848_v44  ;;  %v1696_v5 = vmov 54  }
  0x98   :  { %v115_v2 = vadd.f32 %v1114_v63, %v108_v61  ;;  %348 = vperm.xlu1 %1412, %v1809_v3   ;;  %v1117_v11 = vsel %vm133_vm8, 1.0, %v1677_v47 }
  0x99   :  { %1413 = vset.pattern.permute.xlu2 %v1682_v8 }
  0x9a   :  { %v122_v7 = vadd.f32 %v1115_v4, %v115_v2  ;;  %355 = vperm.xlu2 %1413, %v1809_v3   ;;  %v181_v9 = vpop.permute.xlu2 %180 }
  0x9b   :  { %vm182_vm14 = vcmp.eq.s32.totalorder %v181_v9, %v1848_v44 }
  0x9c   :  { %v129_v10 = vadd.f32 %v1116_v6, %v122_v7  ;;  %v1124_v35 = vsel %vm182_vm14, 1.0, %v1677_v47  ;;  %v1697_v7 = vmov 55  }
  0x9e   :  { %v139_v12 = vpop.permute.xlu1 %138  ;;  %v136_v13 = vadd.f32 %v1117_v11, %v129_v10 }
  0x9f   :  { %vm140_vm10 = vcmp.eq.s32.totalorder %v139_v12, %v1848_v44  ;;  %v167_v22 = vpop.permute.xlu0 %166 }
  0xa0   :  { %v1118_v14 = vsel %vm140_vm10, 1.0, %v1677_v47  ;;  %1414 = vset.pattern.permute.xlu1 %v1683_v16  ;;  %vm168_vm13 = vcmp.eq.s32.totalorder %v167_v22, %v1848_v44  ;;  %v1700_v22 = vmov 68  }
  0xa1   :  { %v143_v17 = vadd.f32 %v1118_v14, %v136_v13  ;;  %362 = vperm.xlu1 %1414, %v1809_v3   ;;  %v1122_v31 = vsel %vm168_vm13, 1.0, %v1677_v47  ;;  %1441 = vset.pattern.permute.xlu0 %v1700_v22 }
  0xa2   :  { %1415 = vset.pattern.permute.xlu2 %v1684_v18  ;;  %551 = vperm.xlu0 %1441, %v1809_v3  }
  0xa3   :  { %v150_v19 = vadd.f32 %v1119_v15, %v143_v17  ;;  %369 = vperm.xlu2 %1415, %v1809_v3   ;;  %v195_v20 = vpop.permute.xlu2 %194  ;;  %v1698_v15 = vmov 56   ;;  %v1699_v17 = vmov 57  }
  0xa4   :  { %vm196_vm0 = vcmp.eq.s32.totalorder %v195_v20, %v1848_v44 }
  0xa5   :  { %v1126_v46 = vsel %vm196_vm0, 1.0, %v1677_v47 }
  0xa7   :  { %v153_v21 = vpop.permute.xlu1 %152 }
  0xa8   :  { %vm154_vm12 = vcmp.eq.s32.totalorder %v153_v21, %v1848_v44  ;;  %v202_v42 = vpop.permute.xlu0 %201 }
  0xa9   :  { %v1120_v24 = vsel %vm154_vm12, 1.0, %v1677_v47  ;;  %1417 = vset.pattern.permute.xlu1 %v1686_v26  ;;  %vm203_vm2 = vcmp.eq.s32.totalorder %v202_v42, %v1848_v44  ;;  %v1705_v42 = vmov 73  }
  0xaa   :  { %v157_v27 = vadd.f32 %v1120_v24, %v150_v19  ;;  %383 = vperm.xlu1 %1417, %v1809_v3   ;;  %v1127_v53 = vsel %vm203_vm2, 1.0, %v1677_v47  ;;  %1446 = vset.pattern.permute.xlu0 %v1705_v42 }
  0xab   :  { %1418 = vset.pattern.permute.xlu2 %v1687_v28  ;;  %586 = vperm.xlu0 %1446, %v1809_v3  }
  0xac   :  { %v164_v29 = vadd.f32 %v1121_v25, %v157_v27  ;;  %390 = vperm.xlu2 %1418, %v1809_v3   ;;  %v216_v30 = vpop.permute.xlu2 %215  ;;  %v1701_v25 = vmov 59   ;;  %v1702_v27 = vmov 60  }
  0xad   :  { %vm217_vm3 = vcmp.eq.s32.totalorder %v216_v30, %v1848_v44 }
  0xae   :  { %v171_v33 = vadd.f32 %v1122_v31, %v164_v29  ;;  %v1129_v57 = vsel %vm217_vm3, 1.0, %v1677_v47 }
  0xb0   :  { %v174_v32 = vpop.permute.xlu1 %173 }
  0xb1   :  { %vm175_vm15 = vcmp.eq.s32.totalorder %v174_v32, %v1848_v44  ;;  %v237_v0 = vpop.permute.xlu0 %236 }
  0xb2   :  { %v1123_v34 = vsel %vm175_vm15, 1.0, %v1677_v47  ;;  %1419 = vset.pattern.permute.xlu1 %v1688_v36  ;;  %vm238_vm7 = vcmp.eq.s32.totalorder %v237_v0, %v1848_v44  ;;  %v1710_v0 = vmov 78  }
  0xb3   :  { %v178_v37 = vadd.f32 %v1123_v34, %v171_v33  ;;  %397 = vperm.xlu1 %1419, %v1809_v3   ;;  %v1132_v10 = vsel %vm238_vm7, 1.0, %v1677_v47  ;;  %1451 = vset.pattern.permute.xlu0 %v1710_v0 }
  0xb4   :  { %1420 = vset.pattern.permute.xlu2 %v1689_v38  ;;  %621 = vperm.xlu0 %1451, %v1809_v3  }
  0xb5   :  { %v185_v39 = vadd.f32 %v1124_v35, %v178_v37  ;;  %404 = vperm.xlu2 %1420, %v1809_v3   ;;  %v230_v40 = vpop.permute.xlu2 %229  ;;  %v1703_v35 = vmov 61   ;;  %v1704_v37 = vmov 62  }
  0xb6   :  { %vm231_vm5 = vcmp.eq.s32.totalorder %v230_v40, %v1848_v44 }
  0xb7   :  { %v1131_v4 = vsel %vm231_vm5, 1.0, %v1677_v47 }
  0xb9   :  { %v188_v41 = vpop.permute.xlu1 %187 }
  0xba   :  { %vm189_vm1 = vcmp.eq.s32.totalorder %v188_v41, %v1848_v44  ;;  %v272_v21 = vpop.permute.xlu0 %271 }
  0xbb   :  { %v1125_v45 = vsel %vm189_vm1, 1.0, %v1677_v47  ;;  %1422 = vset.pattern.permute.xlu1 %v1691_v48  ;;  %vm273_vm12 = vcmp.eq.s32.totalorder %v272_v21, %v1848_v44  ;;  %v1715_v21 = vmov 83  }
  0xbc   :  { %v192_v49 = vadd.f32 %v1125_v45, %v185_v39  ;;  %418 = vperm.xlu1 %1422, %v1809_v3   ;;  %v1137_v30 = vsel %vm273_vm12, 1.0, %v1677_v47  ;;  %1456 = vset.pattern.permute.xlu0 %v1715_v21 }
  0xbd   :  { %1423 = vset.pattern.permute.xlu2 %v1692_v50  ;;  %656 = vperm.xlu0 %1456, %v1809_v3  }
  0xbe   :  { %v199_v51 = vadd.f32 %v1126_v46, %v192_v49  ;;  %425 = vperm.xlu2 %1423, %v1809_v3   ;;  %v251_v52 = vpop.permute.xlu2 %250  ;;  %v1706_v46 = vmov 64   ;;  %v1707_v49 = vmov 65  }
  0xbf   :  { %vm252_vm8 = vcmp.eq.s32.totalorder %v251_v52, %v1848_v44 }
  0xc0   :  { %v206_v55 = vadd.f32 %v1127_v53, %v199_v51  ;;  %v1134_v14 = vsel %vm252_vm8, 1.0, %v1677_v47 }
  0xc2   :  { %v209_v54 = vpop.permute.xlu1 %208 }
  0xc3   :  { %vm210_vm4 = vcmp.eq.s32.totalorder %v209_v54, %v1848_v44  ;;  %v307_v41 = vpop.permute.xlu0 %306 }
  0xc4   :  { %v1128_v56 = vsel %vm210_vm4, 1.0, %v1677_v47  ;;  %1424 = vset.pattern.permute.xlu1 %v1693_v58  ;;  %vm308_vm1 = vcmp.eq.s32.totalorder %v307_v41, %v1848_v44  ;;  %v1720_v41 = vmov 88  }
  0xc5   :  { %v213_v59 = vadd.f32 %v1128_v56, %v206_v55  ;;  %432 = vperm.xlu1 %1424, %v1809_v3   ;;  %v1142_v52 = vsel %vm308_vm1, 1.0, %v1677_v47  ;;  %1461 = vset.pattern.permute.xlu0 %v1720_v41 }
  0xc6   :  { %1425 = vset.pattern.permute.xlu2 %v1694_v60  ;;  %691 = vperm.xlu0 %1461, %v1809_v3  }
  0xc7   :  { %v220_v61 = vadd.f32 %v1129_v57, %v213_v59  ;;  %439 = vperm.xlu2 %1425, %v1809_v3   ;;  %v265_v62 = vpop.permute.xlu2 %264  ;;  %v1708_v57 = vmov 66   ;;  %v1709_v59 = vmov 67  }
  0xc8   :  { %vm266_vm10 = vcmp.eq.s32.totalorder %v265_v62, %v1848_v44 }
  0xc9   :  { %v1136_v24 = vsel %vm266_vm10, 1.0, %v1677_v47 }
  0xcb   :  { %v223_v63 = vpop.permute.xlu1 %222 }
  0xcc   :  { %vm224_vm6 = vcmp.eq.s32.totalorder %v223_v63, %v1848_v44  ;;  %v342_v63 = vpop.permute.xlu0 %341 }
  0xcd   :  { %v1130_v2 = vsel %vm224_vm6, 1.0, %v1677_v47  ;;  %1427 = vset.pattern.permute.xlu1 %v1696_v5  ;;  %vm343_vm6 = vcmp.eq.s32.totalorder %v342_v63, %v1848_v44  ;;  %v1725_v63 = vmov 93  }
  0xce   :  { %v227_v6 = vadd.f32 %v1130_v2, %v220_v61  ;;  %453 = vperm.xlu1 %1427, %v1809_v3   ;;  %1466 = vset.pattern.permute.xlu0 %v1725_v63 }
  0xcf   :  { %1428 = vset.pattern.permute.xlu2 %v1697_v7  ;;  %726 = vperm.xlu0 %1466, %v1809_v3  }
  0xd0   :  { %v234_v8 = vadd.f32 %v1131_v4, %v227_v6  ;;  %460 = vperm.xlu2 %1428, %v1809_v3   ;;  %v286_v9 = vpop.permute.xlu2 %285  ;;  %v1711_v4 = vmov 69   ;;  %v1712_v6 = vmov 70  }
  0xd1   :  { %vm287_vm13 = vcmp.eq.s32.totalorder %v286_v9, %v1848_v44  ;;  %v1147_v9 = vsel %vm343_vm6, 1.0, %v1677_v47 }
  0xd2   :  { %v241_v12 = vadd.f32 %v1132_v10, %v234_v8  ;;  %v1139_v34 = vsel %vm287_vm13, 1.0, %v1677_v47 }
  0xd4   :  { %v244_v11 = vpop.permute.xlu1 %243 }
  0xd5   :  { %vm245_vm9 = vcmp.eq.s32.totalorder %v244_v11, %v1848_v44 }
  0xd6   :  { %v1133_v13 = vsel %vm245_vm9, 1.0, %v1677_v47  ;;  %1429 = vset.pattern.permute.xlu1 %v1698_v15 }
  0xd7   :  { %v248_v16 = vadd.f32 %v1133_v13, %v241_v12  ;;  %467 = vperm.xlu1 %1429, %v1809_v3  }
  0xd8   :  { %1430 = vset.pattern.permute.xlu2 %v1699_v17 }
  0xd9   :  { %v255_v18 = vadd.f32 %v1134_v14, %v248_v16  ;;  %474 = vperm.xlu2 %1430, %v1809_v3   ;;  %v300_v19 = vpop.permute.xlu2 %299  ;;  %v1713_v14 = vmov 71   ;;  %v1714_v16 = vmov 72  }
  0xda   :  { %vm301_vm15 = vcmp.eq.s32.totalorder %v300_v19, %v1848_v44 }
  0xdb   :  { %v1141_v45 = vsel %vm301_vm15, 1.0, %v1677_v47 }
  0xdd   :  { %v258_v20 = vpop.permute.xlu1 %257 }
  0xde   :  { %vm259_vm11 = vcmp.eq.s32.totalorder %v258_v20, %v1848_v44  ;;  %v377_v20 = vpop.permute.xlu0 %376 }
  0xdf   :  { %v1135_v23 = vsel %vm259_vm11, 1.0, %v1677_v47  ;;  %1432 = vset.pattern.permute.xlu1 %v1701_v25  ;;  %vm378_vm11 = vcmp.eq.s32.totalorder %v377_v20, %v1848_v44  ;;  %v1730_v20 = vmov 98  }
  0xe0   :  { %v262_v26 = vadd.f32 %v1135_v23, %v255_v18  ;;  %488 = vperm.xlu1 %1432, %v1809_v3   ;;  %1471 = vset.pattern.permute.xlu0 %v1730_v20 }
  0xe1   :  { %1433 = vset.pattern.permute.xlu2 %v1702_v27  ;;  %761 = vperm.xlu0 %1471, %v1809_v3  }
  0xe2   :  { %v269_v28 = vadd.f32 %v1136_v24, %v262_v26  ;;  %495 = vperm.xlu2 %1433, %v1809_v3   ;;  %v321_v29 = vpop.permute.xlu2 %320  ;;  %v1716_v24 = vmov 74   ;;  %v1717_v26 = vmov 75  }
  0xe3   :  { %vm322_vm2 = vcmp.eq.s32.totalorder %v321_v29, %v1848_v44  ;;  %v1152_v29 = vsel %vm378_vm11, 1.0, %v1677_v47 }
  0xe4   :  { %v276_v32 = vadd.f32 %v1137_v30, %v269_v28  ;;  %v1144_v56 = vsel %vm322_vm2, 1.0, %v1677_v47 }
  0xe6   :  { %v279_v31 = vpop.permute.xlu1 %278 }
  0xe7   :  { %vm280_vm14 = vcmp.eq.s32.totalorder %v279_v31, %v1848_v44 }
  0xe8   :  { %v1138_v33 = vsel %vm280_vm14, 1.0, %v1677_v47  ;;  %1434 = vset.pattern.permute.xlu1 %v1703_v35 }
  0xe9   :  { %v283_v36 = vadd.f32 %v1138_v33, %v276_v32  ;;  %502 = vperm.xlu1 %1434, %v1809_v3  }
  0xea   :  { %1435 = vset.pattern.permute.xlu2 %v1704_v37 }
  0xeb   :  { %v290_v38 = vadd.f32 %v1139_v34, %v283_v36  ;;  %509 = vperm.xlu2 %1435, %v1809_v3   ;;  %v335_v39 = vpop.permute.xlu2 %334  ;;  %v1718_v34 = vmov 76   ;;  %v1719_v36 = vmov 77  }
  0xec   :  { %vm336_vm4 = vcmp.eq.s32.totalorder %v335_v39, %v1848_v44 }
  0xed   :  { %v1146_v2 = vsel %vm336_vm4, 1.0, %v1677_v47 }
  0xef   :  { %v293_v40 = vpop.permute.xlu1 %292 }
  0xf0   :  { %vm294_vm0 = vcmp.eq.s32.totalorder %v293_v40, %v1848_v44  ;;  %v412_v40 = vpop.permute.xlu0 %411 }
  0xf1   :  { %v1140_v43 = vsel %vm294_vm0, 1.0, %v1677_v47  ;;  %1437 = vset.pattern.permute.xlu1 %v1706_v46  ;;  %vm413_vm0 = vcmp.eq.s32.totalorder %v412_v40, %v1848_v44  ;;  %v1735_v40 = vmov 103  }
  0xf2   :  { %v297_v48 = vadd.f32 %v1140_v43, %v290_v38  ;;  %523 = vperm.xlu1 %1437, %v1809_v3   ;;  %1476 = vset.pattern.permute.xlu0 %v1735_v40  ;;  %v1752_v40 = vmov 110  }
  0xf3   :  { %1438 = vset.pattern.permute.xlu2 %v1707_v49 }
  0xf4   :  { %v304_v50 = vadd.f32 %v1141_v45, %v297_v48  ;;  %530 = vperm.xlu2 %1438, %v1809_v3   ;;  %v356_v51 = vpop.permute.xlu2 %355  ;;  %v1721_v45 = vmov 79   ;;  %v1722_v48 = vmov 80  }
  0xf5   :  { %vm357_vm7 = vcmp.eq.s32.totalorder %v356_v51, %v1848_v44  ;;  %v1157_v51 = vsel %vm413_vm0, 1.0, %v1677_v47 }
  0xf6   :  { %v311_v54 = vadd.f32 %v1142_v52, %v304_v50  ;;  %v1149_v13 = vsel %vm357_vm7, 1.0, %v1677_v47 }
  0xf8   :  { %v314_v53 = vpop.permute.xlu1 %313 }
  0xf9   :  { %vm315_vm3 = vcmp.eq.s32.totalorder %v314_v53, %v1848_v44 }
  0xfa   :  { %v1143_v55 = vsel %vm315_vm3, 1.0, %v1677_v47  ;;  %1439 = vset.pattern.permute.xlu1 %v1708_v57 }
  0xfb   :  { %v318_v58 = vadd.f32 %v1143_v55, %v311_v54  ;;  %537 = vperm.xlu1 %1439, %v1809_v3  }
  0xfc   :  { %1440 = vset.pattern.permute.xlu2 %v1709_v59 }
  0xfd   :  { %v325_v60 = vadd.f32 %v1144_v56, %v318_v58  ;;  %544 = vperm.xlu2 %1440, %v1809_v3   ;;  %v370_v61 = vpop.permute.xlu2 %369  ;;  %v1723_v56 = vmov 81   ;;  %v1724_v58 = vmov 82  }
  0xfe   :  { %vm371_vm9 = vcmp.eq.s32.totalorder %v370_v61, %v1848_v44 }
  0xff   :  { %v1151_v23 = vsel %vm371_vm9, 1.0, %v1677_v47 }
 0x101   :  { %v328_v62 = vpop.permute.xlu1 %327 }
 0x102   :  { %vm329_vm5 = vcmp.eq.s32.totalorder %v328_v62, %v1848_v44  ;;  %v447_v62 = vpop.permute.xlu0 %446 }
 0x103   :  { %v1145_v1 = vsel %vm329_vm5, 1.0, %v1677_v47  ;;  %1442 = vset.pattern.permute.xlu1 %v1711_v4  ;;  %vm448_vm5 = vcmp.eq.s32.totalorder %v447_v62, %v1848_v44  ;;  %v1740_v62 = vmov 108  }
 0x104   :  { %v332_v5 = vadd.f32 %v1145_v1, %v325_v60  ;;  %558 = vperm.xlu1 %1442, %v1809_v3  }
 0x105   :  { %1443 = vset.pattern.permute.xlu2 %v1712_v6 }
 0x106   :  { %v339_v7 = vadd.f32 %v1146_v2, %v332_v5  ;;  %565 = vperm.xlu2 %1443, %v1809_v3   ;;  %v391_v8 = vpop.permute.xlu2 %390  ;;  %v1726_v2 = vmov 84   ;;  %v1727_v5 = vmov 85  }
 0x107   :  { %vm392_vm12 = vcmp.eq.s32.totalorder %v391_v8, %v1848_v44  ;;  %v1162_v8 = vsel %vm448_vm5, 1.0, %v1677_v47 }
 0x108   :  { %v346_v11 = vadd.f32 %v1147_v9, %v339_v7  ;;  %v1154_v33 = vsel %vm392_vm12, 1.0, %v1677_v47 }
 0x10a   :  { %v349_v10 = vpop.permute.xlu1 %348 }
 0x10b   :  { %vm350_vm8 = vcmp.eq.s32.totalorder %v349_v10, %v1848_v44 }
 0x10c   :  { %v1148_v12 = vsel %vm350_vm8, 1.0, %v1677_v47  ;;  %1444 = vset.pattern.permute.xlu1 %v1713_v14 }
 0x10d   :  { %v353_v15 = vadd.f32 %v1148_v12, %v346_v11  ;;  %572 = vperm.xlu1 %1444, %v1809_v3  }
 0x10e   :  { %1445 = vset.pattern.permute.xlu2 %v1714_v16 }
 0x10f   :  { %v360_v17 = vadd.f32 %v1149_v13, %v353_v15  ;;  %579 = vperm.xlu2 %1445, %v1809_v3   ;;  %v405_v18 = vpop.permute.xlu2 %404  ;;  %v1728_v13 = vmov 86   ;;  %v1729_v15 = vmov 87  }
 0x110   :  { %vm406_vm14 = vcmp.eq.s32.totalorder %v405_v18, %v1848_v44 }
 0x111   :  { %v1156_v43 = vsel %vm406_vm14, 1.0, %v1677_v47 }
 0x113   :  { %v363_v19 = vpop.permute.xlu1 %362 }
 0x114   :  { %vm364_vm10 = vcmp.eq.s32.totalorder %v363_v19, %v1848_v44  ;;  %v482_v19 = vpop.permute.xlu0 %481 }
 0x115   :  { %v1150_v22 = vsel %vm364_vm10, 1.0, %v1677_v47  ;;  %1447 = vset.pattern.permute.xlu1 %v1716_v24  ;;  %vm483_vm10 = vcmp.eq.s32.totalorder %v482_v19, %v1848_v44  ;;  %v1745_v19 = vmov 113  }
 0x116   :  { %v367_v25 = vadd.f32 %v1150_v22, %v360_v17  ;;  %593 = vperm.xlu1 %1447, %v1809_v3  }
 0x117   :  { %1448 = vset.pattern.permute.xlu2 %v1717_v26 }
 0x118   :  { %v374_v27 = vadd.f32 %v1151_v23, %v367_v25  ;;  %600 = vperm.xlu2 %1448, %v1809_v3   ;;  %v426_v28 = vpop.permute.xlu2 %425  ;;  %v1731_v23 = vmov 89   ;;  %v1732_v25 = vmov 90  }
 0x119   :  { %vm427_vm1 = vcmp.eq.s32.totalorder %v426_v28, %v1848_v44 }
 0x11a   :  { %v381_v31 = vadd.f32 %v1152_v29, %v374_v27  ;;  %v1159_v55 = vsel %vm427_vm1, 1.0, %v1677_v47  ;;  %v2022_v27 = vld [vmem:[#allocation3] sm:$0xff]  ;;  %v1167_v29 = vsel %vm483_vm10, 1.0, %v1677_v47 }
 0x11b   :  { %796 = vperm.xlu0 %1476, %v2022_v27  }
 0x11c   :  { %v384_v30 = vpop.permute.xlu1 %383 }
 0x11d   :  { %vm385_vm13 = vcmp.eq.s32.totalorder %v384_v30, %v1848_v44 }
 0x11e   :  { %v1153_v32 = vsel %vm385_vm13, 1.0, %v1677_v47  ;;  %1449 = vset.pattern.permute.xlu1 %v1718_v34 }
 0x11f   :  { %v388_v35 = vadd.f32 %v1153_v32, %v381_v31  ;;  %607 = vperm.xlu1 %1449, %v1809_v3  }
 0x120   :  { %1450 = vset.pattern.permute.xlu2 %v1719_v36 }
 0x121   :  { %v395_v37 = vadd.f32 %v1154_v33, %v388_v35  ;;  %614 = vperm.xlu2 %1450, %v1809_v3   ;;  %v440_v38 = vpop.permute.xlu2 %439  ;;  %v1733_v33 = vmov 91   ;;  %v1734_v35 = vmov 92  }
 0x122   :  { %vm441_vm3 = vcmp.eq.s32.totalorder %v440_v38, %v1848_v44 }
 0x123   :  { %v1161_v1 = vsel %vm441_vm3, 1.0, %v1677_v47  ;;  %1481 = vset.pattern.permute.xlu0 %v1740_v62 }
 0x124   :  { %831 = vperm.xlu0 %1481, %v2022_v27  }
 0x125   :  { %v398_v39 = vpop.permute.xlu1 %397 }
 0x126   :  { %vm399_vm15 = vcmp.eq.s32.totalorder %v398_v39, %v1848_v44  ;;  %v517_v39 = vpop.permute.xlu0 %516 }
 0x127   :  { %v1155_v42 = vsel %vm399_vm15, 1.0, %v1677_v47  ;;  %1452 = vset.pattern.permute.xlu1 %v1721_v45  ;;  %vm518_vm15 = vcmp.eq.s32.totalorder %v517_v39, %v1848_v44  ;;  %v1751_v39 = vmov 109  }
 0x128   :  { %v402_v46 = vadd.f32 %v1155_v42, %v395_v37  ;;  %628 = vperm.xlu1 %1452, %v1809_v3  }
 0x129   :  { %1453 = vset.pattern.permute.xlu2 %v1722_v48 }
 0x12a   :  { %v409_v49 = vadd.f32 %v1156_v43, %v402_v46  ;;  %635 = vperm.xlu2 %1453, %v1809_v3   ;;  %v461_v50 = vpop.permute.xlu2 %460  ;;  %v1736_v43 = vmov 94   ;;  %v1737_v46 = vmov 95  }
 0x12b   :  { %vm462_vm6 = vcmp.eq.s32.totalorder %v461_v50, %v1848_v44  ;;  %v1172_v50 = vsel %vm518_vm15, 1.0, %v1677_v47 }
 0x12c   :  { %v416_v53 = vadd.f32 %v1157_v51, %v409_v49  ;;  %v1164_v12 = vsel %vm462_vm6, 1.0, %v1677_v47  ;;  %1486 = vset.pattern.permute.xlu0 %v1745_v19 }
 0x12d   :  { %866 = vperm.xlu0 %1486, %v2022_v27  }
 0x12e   :  { %v419_v52 = vpop.permute.xlu1 %418 }
 0x12f   :  { %vm420_vm2 = vcmp.eq.s32.totalorder %v419_v52, %v1848_v44 }
 0x130   :  { %v1158_v54 = vsel %vm420_vm2, 1.0, %v1677_v47  ;;  %1454 = vset.pattern.permute.xlu1 %v1723_v56 }
 0x131   :  { %v423_v57 = vadd.f32 %v1158_v54, %v416_v53  ;;  %642 = vperm.xlu1 %1454, %v1809_v3  }
 0x132   :  { %1455 = vset.pattern.permute.xlu2 %v1724_v58 }
 0x133   :  { %v430_v59 = vadd.f32 %v1159_v55, %v423_v57  ;;  %649 = vperm.xlu2 %1455, %v1809_v3   ;;  %v475_v60 = vpop.permute.xlu2 %474  ;;  %v1738_v55 = vmov 96   ;;  %v1739_v57 = vmov 97  }
 0x134   :  { %vm476_vm8 = vcmp.eq.s32.totalorder %v475_v60, %v1848_v44 }
 0x135   :  { %v1166_v22 = vsel %vm476_vm8, 1.0, %v1677_v47 }
 0x137   :  { %v433_v61 = vpop.permute.xlu1 %432 }
 0x138   :  { %vm434_vm4 = vcmp.eq.s32.totalorder %v433_v61, %v1848_v44  ;;  %v552_v61 = vpop.permute.xlu0 %551 }
 0x139   :  { %v1160_v0 = vsel %vm434_vm4, 1.0, %v1677_v47  ;;  %1457 = vset.pattern.permute.xlu1 %v1726_v2  ;;  %vm553_vm4 = vcmp.eq.s32.totalorder %v552_v61, %v1848_v44 }
 0x13a   :  { %v437_v4 = vadd.f32 %v1160_v0, %v430_v59  ;;  %663 = vperm.xlu1 %1457, %v1809_v3  }
 0x13b   :  { %1458 = vset.pattern.permute.xlu2 %v1727_v5 }
 0x13c   :  { %v444_v6 = vadd.f32 %v1161_v1, %v437_v4  ;;  %670 = vperm.xlu2 %1458, %v1809_v3   ;;  %v496_v7 = vpop.permute.xlu2 %495  ;;  %v1741_v1 = vmov 99   ;;  %v1742_v4 = vmov 100  }
 0x13d   :  { %vm497_vm11 = vcmp.eq.s32.totalorder %v496_v7, %v1848_v44  ;;  %v1177_v7 = vsel %vm553_vm4, 1.0, %v1677_v47 }
 0x13e   :  { %v451_v10 = vadd.f32 %v1162_v8, %v444_v6  ;;  %v1169_v32 = vsel %vm497_vm11, 1.0, %v1677_v47 }
 0x140   :  { %v454_v9 = vpop.permute.xlu1 %453 }
 0x141   :  { %vm455_vm7 = vcmp.eq.s32.totalorder %v454_v9, %v1848_v44 }
 0x142   :  { %v1163_v11 = vsel %vm455_vm7, 1.0, %v1677_v47  ;;  %1459 = vset.pattern.permute.xlu1 %v1728_v13 }
 0x143   :  { %v458_v14 = vadd.f32 %v1163_v11, %v451_v10  ;;  %677 = vperm.xlu1 %1459, %v1809_v3  }
 0x144   :  { %1460 = vset.pattern.permute.xlu2 %v1729_v15 }
 0x145   :  { %v465_v16 = vadd.f32 %v1164_v12, %v458_v14  ;;  %684 = vperm.xlu2 %1460, %v1809_v3   ;;  %v510_v17 = vpop.permute.xlu2 %509  ;;  %v1743_v12 = vmov 101   ;;  %v1744_v14 = vmov 102  }
 0x146   :  { %vm511_vm13 = vcmp.eq.s32.totalorder %v510_v17, %v1848_v44 }
 0x147   :  { %v1171_v42 = vsel %vm511_vm13, 1.0, %v1677_v47 }
 0x149   :  { %v468_v18 = vpop.permute.xlu1 %467 }
 0x14a   :  { %vm469_vm9 = vcmp.eq.s32.totalorder %v468_v18, %v1848_v44  ;;  %v587_v18 = vpop.permute.xlu0 %586 }
 0x14b   :  { %v1165_v21 = vsel %vm469_vm9, 1.0, %v1677_v47  ;;  %1462 = vset.pattern.permute.xlu1 %v1731_v23  ;;  %vm588_vm9 = vcmp.eq.s32.totalorder %v587_v18, %v1848_v44  ;;  %v1762_v18 = vmov 121  }
 0x14c   :  { %v472_v24 = vadd.f32 %v1165_v21, %v465_v16  ;;  %698 = vperm.xlu1 %1462, %v1809_v3  }
 0x14d   :  { %1463 = vset.pattern.permute.xlu2 %v1732_v25 }
 0x14e   :  { %v479_v26 = vadd.f32 %v1166_v22, %v472_v24  ;;  %705 = vperm.xlu2 %1463, %v2022_v27   ;;  %v531_v28 = vpop.permute.xlu2 %530  ;;  %v1746_v22 = vmov 104   ;;  %v1747_v24 = vmov 105  }
 0x14f   :  { %vm532_vm0 = vcmp.eq.s32.totalorder %v531_v28, %v1848_v44  ;;  %v1182_v28 = vsel %vm588_vm9, 1.0, %v1677_v47 }
 0x150   :  { %v486_v31 = vadd.f32 %v1167_v29, %v479_v26  ;;  %v1174_v54 = vsel %vm532_vm0, 1.0, %v1677_v47 }
 0x152   :  { %v489_v30 = vpop.permute.xlu1 %488 }
 0x153   :  { %vm490_vm12 = vcmp.eq.s32.totalorder %v489_v30, %v1848_v44 }
 0x154   :  { %v1168_v3 = vsel %vm490_vm12, 1.0, %v1677_v47  ;;  %1464 = vset.pattern.permute.xlu1 %v1733_v33 }
 0x155   :  { %v493_v34 = vadd.f32 %v1168_v3, %v486_v31  ;;  %712 = vperm.xlu1 %1464, %v2022_v27  }
 0x156   :  { %1465 = vset.pattern.permute.xlu2 %v1734_v35 }
 0x157   :  { %v500_v36 = vadd.f32 %v1169_v32, %v493_v34  ;;  %719 = vperm.xlu2 %1465, %v2022_v27   ;;  %v545_v37 = vpop.permute.xlu2 %544  ;;  %v1748_v32 = vmov 106   ;;  %v1749_v34 = vmov 107  }
 0x158   :  { %vm546_vm2 = vcmp.eq.s32.totalorder %v545_v37, %v1848_v44 }
 0x159   :  { %v1176_v0 = vsel %vm546_vm2, 1.0, %v1677_v47 }
 0x15b   :  { %v503_v38 = vpop.permute.xlu1 %502 }
 0x15c   :  { %vm504_vm14 = vcmp.eq.s32.totalorder %v503_v38, %v1848_v44  ;;  %v1750_v38 = vmov 118  }
 0x15d   :  { %v1170_v41 = vsel %vm504_vm14, 1.0, %v1677_v47  ;;  %1467 = vset.pattern.permute.xlu1 %v1736_v43  ;;  %1491 = vset.pattern.permute.xlu0 %v1750_v38  ;;  %v1753_v43 = vmov 111   ;;  %v1767_v38 = vmov 126  }
 0x15e   :  { %v507_v45 = vadd.f32 %v1170_v41, %v500_v36  ;;  %733 = vperm.xlu1 %1467, %v2022_v27   ;;  %901 = vperm.xlu0 %1491, %v2022_v27  }
 0x15f   :  { %1468 = vset.pattern.permute.xlu2 %v1737_v46 }
 0x160   :  { %v514_v48 = vadd.f32 %v1171_v42, %v507_v45  ;;  %740 = vperm.xlu2 %1468, %v2022_v27   ;;  %v566_v49 = vpop.permute.xlu2 %565  ;;  %v1754_v45 = vmov 112  }
 0x161   :  { %vm567_vm5 = vcmp.eq.s32.totalorder %v566_v49, %v1848_v44  ;;  %v1755_v49 = vmov 123  }
 0x162   :  { %v521_v52 = vadd.f32 %v1172_v50, %v514_v48  ;;  %v1179_v11 = vsel %vm567_vm5, 1.0, %v1677_v47 }
 0x164   :  { %v524_v51 = vpop.permute.xlu1 %523 }
 0x165   :  { %vm525_vm1 = vcmp.eq.s32.totalorder %v524_v51, %v1848_v44  ;;  %v1756_v51 = vmov 114  }
 0x166   :  { %v1173_v53 = vsel %vm525_vm1, 1.0, %v1677_v47  ;;  %1469 = vset.pattern.permute.xlu1 %v1738_v55  ;;  %1496 = vset.pattern.permute.xlu0 %v1755_v49 }
 0x167   :  { %v528_v56 = vadd.f32 %v1173_v53, %v521_v52  ;;  %747 = vperm.xlu1 %1469, %v2022_v27   ;;  %936 = vperm.xlu0 %1496, %v2022_v27   ;;  %v622_v52 = vpop.permute.xlu0 %621  ;;  %v1757_v53 = vmov 115  }
 0x168   :  { %1470 = vset.pattern.permute.xlu2 %v1739_v57  ;;  %vm623_vm14 = vcmp.eq.s32.totalorder %v622_v52, %v1848_v44 }
 0x169   :  { %v535_v58 = vadd.f32 %v1174_v54, %v528_v56  ;;  %754 = vperm.xlu2 %1470, %v2022_v27   ;;  %v580_v59 = vpop.permute.xlu2 %579 }
 0x16a   :  { %vm581_vm7 = vcmp.eq.s32.totalorder %v580_v59, %v1848_v44  ;;  %v1187_v59 = vsel %vm623_vm14, 1.0, %v1677_v47 }
 0x16b   :  { %v1181_v21 = vsel %vm581_vm7, 1.0, %v1677_v47 }
 0x16d   :  { %v538_v60 = vpop.permute.xlu1 %537 }
 0x16e   :  { %vm539_vm3 = vcmp.eq.s32.totalorder %v538_v60, %v1848_v44  ;;  %v1758_v60 = vmov 116  }
 0x16f   :  { %v1175_v63 = vsel %vm539_vm3, 1.0, %v1677_v47  ;;  %1472 = vset.pattern.permute.xlu1 %v1741_v1 }
 0x170   :  { %v542_v2 = vadd.f32 %v1175_v63, %v535_v58  ;;  %768 = vperm.xlu1 %1472, %v2022_v27   ;;  %v1759_v63 = vmov 117  }
 0x171   :  { %1473 = vset.pattern.permute.xlu2 %v1742_v4 }
 0x172   :  { %v549_v5 = vadd.f32 %v1176_v0, %v542_v2  ;;  %775 = vperm.xlu2 %1473, %v2022_v27   ;;  %v601_v6 = vpop.permute.xlu2 %600 }
 0x173   :  { %vm602_vm10 = vcmp.eq.s32.totalorder %v601_v6, %v1848_v44 }
 0x174   :  { %v556_v9 = vadd.f32 %v1177_v7, %v549_v5  ;;  %v1184_v3 = vsel %vm602_vm10, 1.0, %v1677_v47  ;;  %v657_v7 = vpop.permute.xlu0 %656 }
 0x175   :  { %vm658_vm3 = vcmp.eq.s32.totalorder %v657_v7, %v1848_v44 }
 0x176   :  { %v559_v8 = vpop.permute.xlu1 %558 }
 0x177   :  { %vm560_vm6 = vcmp.eq.s32.totalorder %v559_v8, %v1848_v44  ;;  %v1760_v8 = vmov 119  }
 0x178   :  { %v1178_v10 = vsel %vm560_vm6, 1.0, %v1677_v47  ;;  %1474 = vset.pattern.permute.xlu1 %v1743_v12 }
 0x179   :  { %v563_v13 = vadd.f32 %v1178_v10, %v556_v9  ;;  %782 = vperm.xlu1 %1474, %v2022_v27  }
 0x17a   :  { %1475 = vset.pattern.permute.xlu2 %v1744_v14 }
 0x17b   :  { %v570_v15 = vadd.f32 %v1179_v11, %v563_v13  ;;  %789 = vperm.xlu2 %1475, %v2022_v27   ;;  %v2062_v16 = vpop.permute.xlu2 %614  ;;  %v1761_v11 = vmov 120   ;;  %v1192_v13 = vsel %vm658_vm3, 1.0, %v1677_v47 }
 0x17c   :  { %vm616_vm13 = vcmp.eq.s32.totalorder %v2062_v16, %v1848_v44 }
 0x17d   :  { %v1186_v55 = vsel %vm616_vm13, 1.0, %v1677_v47 }
 0x17f   :  { %v573_v17 = vpop.permute.xlu1 %572 }
 0x180   :  { %vm574_vm8 = vcmp.eq.s32.totalorder %v573_v17, %v1848_v44 }
 0x181   :  { %v1180_v20 = vsel %vm574_vm8, 1.0, %v1677_v47  ;;  %1477 = vset.pattern.permute.xlu1 %v1746_v22 }
 0x182   :  { %v577_v23 = vadd.f32 %v1180_v20, %v570_v15  ;;  %803 = vperm.xlu1 %1477, %v2022_v27   ;;  %v1763_v20 = vmov 122  }
 0x183   :  { %1478 = vset.pattern.permute.xlu2 %v1747_v24  ;;  %v692_v24 = vpop.permute.xlu0 %691 }
 0x184   :  { %v584_v25 = vadd.f32 %v1181_v21, %v577_v23  ;;  %810 = vperm.xlu2 %1478, %v2022_v27   ;;  %v2072_v26 = vpop.permute.xlu2 %635  ;;  %vm693_vm8 = vcmp.eq.s32.totalorder %v692_v24, %v1848_v44 }
 0x185   :  { %vm637_vm0 = vcmp.eq.s32.totalorder %v2072_v26, %v1848_v44 }
 0x186   :  { %v591_v30 = vadd.f32 %v1182_v28, %v584_v25  ;;  %v1189_v1 = vsel %vm637_vm0, 1.0, %v1677_v47 }
 0x188   :  { %v594_v29 = vpop.permute.xlu1 %593 }
 0x189   :  { %vm595_vm11 = vcmp.eq.s32.totalorder %v594_v29, %v1848_v44  ;;  %v1764_v29 = vmov 124  }
 0x18a   :  { %v1183_v31 = vsel %vm595_vm11, 1.0, %v1677_v47  ;;  %1479 = vset.pattern.permute.xlu1 %v1748_v32  ;;  %v1766_v32 = vmov 127  }
 0x18b   :  { %v598_v33 = vadd.f32 %v1183_v31, %v591_v30  ;;  %817 = vperm.xlu1 %1479, %v2022_v27   ;;  %v1765_v31 = vmov 125   ;;  %1501 = vset.pattern.permute.xlu0 %v1766_v32 }
 0x18c   :  { %1480 = vset.pattern.permute.xlu2 %v1749_v34 }
 0x18d   :  { %v605_v35 = vadd.f32 %v1184_v3, %v598_v33  ;;  %824 = vperm.xlu2 %1480, %v2022_v27   ;;  %v2081_v36 = vpop.permute.xlu2 %649  ;;  %v1197_v33 = vsel %vm693_vm8, 1.0, %v1677_v47 }
 0x18e   :  { %vm651_vm2 = vcmp.eq.s32.totalorder %v2081_v36, %v1848_v44 }
 0x18f   :  { %v1191_v10 = vsel %vm651_vm2, 1.0, %v1677_v47 }
 0x191   :  { %v608_v37 = vpop.permute.xlu1 %607 }
 0x192   :  { %vm609_vm12 = vcmp.eq.s32.totalorder %v608_v37, %v1848_v44 }
 0x193   :  { %1482 = vset.pattern.permute.xlu1 %v1751_v39  ;;  %v1185_v50 = vsel %vm609_vm12, 1.0, %v1677_v47 }
 0x194   :  { %838 = vperm.xlu1 %1482, %v2022_v27   ;;  %v612_v54 = vadd.f32 %v1185_v50, %v605_v35 }
 0x195   :  { %1483 = vset.pattern.permute.xlu2 %v1752_v40 }
 0x196   :  { %845 = vperm.xlu2 %1483, %v2022_v27   ;;  %v2086_v41 = vpop.permute.xlu2 %670  ;;  %v619_v57 = vadd.f32 %v1186_v55, %v612_v54 }
 0x197   :  { %vm672_vm5 = vcmp.eq.s32.totalorder %v2086_v41, %v1848_v44 }
 0x198   :  { %v626_v62 = vadd.f32 %v1187_v59, %v619_v57  ;;  %v1194_v21 = vsel %vm672_vm5, 1.0, %v1677_v47 }
 0x19a   :  { %v629_v42 = vpop.permute.xlu1 %628 }
 0x19b   :  { %vm630_vm15 = vcmp.eq.s32.totalorder %v629_v42, %v1848_v44 }
 0x19c   :  { %1484 = vset.pattern.permute.xlu1 %v1753_v43  ;;  %v1188_v61 = vsel %vm630_vm15, 1.0, %v1677_v47  ;;  %v727_v43 = vpop.permute.xlu0 %726 }
 0x19d   :  { %852 = vperm.xlu1 %1484, %v2022_v27   ;;  %v633_v0 = vadd.f32 %v1188_v61, %v626_v62  ;;  %vm728_vm13 = vcmp.eq.s32.totalorder %v727_v43, %v1848_v44  ;;  %v987_v43 = vld [vmem:[#allocation6 + $0x50] sm:$0xff] }
 0x19e   :  { %1485 = vset.pattern.permute.xlu2 %v1754_v45  ;;  %v1202_v50 = vsel %vm728_vm13, 1.0, %v1677_v47 }
 0x19f   :  { %859 = vperm.xlu2 %1485, %v2022_v27   ;;  %v2090_v46 = vpop.permute.xlu2 %684  ;;  %v640_v6 = vadd.f32 %v1189_v1, %v633_v0 }
 0x1a0   :  { %vm686_vm7 = vcmp.eq.s32.totalorder %v2090_v46, %v1848_v44 }
 0x1a1   :  { %v1196_v28 = vsel %vm686_vm7, 1.0, %v1677_v47 }
 0x1a3   :  { %v643_v48 = vpop.permute.xlu1 %642 }
 0x1a4   :  { %vm644_vm1 = vcmp.eq.s32.totalorder %v643_v48, %v1848_v44 }
 0x1a5   :  { %1487 = vset.pattern.permute.xlu1 %v1756_v51  ;;  %v1190_v2 = vsel %vm644_vm1, 1.0, %v1677_v47 }
 0x1a6   :  { %873 = vperm.xlu1 %1487, %v2022_v27   ;;  %v647_v9 = vadd.f32 %v1190_v2, %v640_v6 }
 0x1a7   :  { %1488 = vset.pattern.permute.xlu2 %v1757_v53 }
 0x1a8   :  { %880 = vperm.xlu2 %1488, %v2022_v27   ;;  %v2101_v56 = vpop.permute.xlu2 %705  ;;  %v654_v12 = vadd.f32 %v1191_v10, %v647_v9 }
 0x1a9   :  { %vm707_vm10 = vcmp.eq.s32.totalorder %v2101_v56, %v1848_v44 }
 0x1aa   :  { %v661_v17 = vadd.f32 %v1192_v13, %v654_v12  ;;  %v1199_v39 = vsel %vm707_vm10, 1.0, %v1677_v47 }
 0x1ac   :  { %v664_v58 = vpop.permute.xlu1 %663 }
 0x1ad   :  { %vm665_vm4 = vcmp.eq.s32.totalorder %v664_v58, %v1848_v44  ;;  %v762_v58 = vpop.permute.xlu0 %761 }
 0x1ae   :  { %1489 = vset.pattern.permute.xlu1 %v1758_v60  ;;  %v1193_v15 = vsel %vm665_vm4, 1.0, %v1677_v47  ;;  %vm763_vm2 = vcmp.eq.s32.totalorder %v762_v58, %v1848_v44  ;;  %v982_v58 = vld [vmem:[#allocation6 + $0x28] sm:$0xff] }
 0x1af   :  { %887 = vperm.xlu1 %1489, %v2022_v27   ;;  %v668_v19 = vadd.f32 %v1193_v15, %v661_v17  ;;  %v1207_v0 = vsel %vm763_vm2, 1.0, %v1677_v47 }
 0x1b0   :  { %1490 = vset.pattern.permute.xlu2 %v1759_v63 }
 0x1b1   :  { %894 = vperm.xlu2 %1490, %v2022_v27   ;;  %v2113_v5 = vpop.permute.xlu2 %719  ;;  %v675_v23 = vadd.f32 %v1194_v21, %v668_v19 }
 0x1b2   :  { %vm721_vm12 = vcmp.eq.s32.totalorder %v2113_v5, %v1848_v44 }
 0x1b3   :  { %v1201_v46 = vsel %vm721_vm12, 1.0, %v1677_v47 }
 0x1b5   :  { %v678_v4 = vpop.permute.xlu1 %677  ;;  %v797_v10 = vpop.permute.xlu0 %796 }
 0x1b6   :  { %vm679_vm6 = vcmp.eq.s32.totalorder %v678_v4, %v1848_v44  ;;  %vm798_vm7 = vcmp.eq.s32.totalorder %v797_v10, %v1848_v44 }
 0x1b7   :  { %1492 = vset.pattern.permute.xlu1 %v1760_v8  ;;  %v1195_v22 = vsel %vm679_vm6, 1.0, %v1677_v47  ;;  %v1212_v15 = vsel %vm798_vm7, 1.0, %v1677_v47 }
 0x1b8   :  { %908 = vperm.xlu1 %1492, %v2022_v27   ;;  %v682_v26 = vadd.f32 %v1195_v22, %v675_v23 }
 0x1b9   :  { %1493 = vset.pattern.permute.xlu2 %v1761_v11 }
 0x1ba   :  { %915 = vperm.xlu2 %1493, %v2022_v27   ;;  %v2124_v16 = vpop.permute.xlu2 %740  ;;  %v689_v3 = vadd.f32 %v1196_v28, %v682_v26 }
 0x1bb   :  { %vm742_vm15 = vcmp.eq.s32.totalorder %v2124_v16, %v1848_v44 }
 0x1bc   :  { %v696_v35 = vadd.f32 %v1197_v33, %v689_v3  ;;  %v1204_v55 = vsel %vm742_vm15, 1.0, %v1677_v47  ;;  %v991_v3 = vld [vmem:[#allocation6 + $0x70] sm:$0xff] }
 0x1be   :  { %v699_v14 = vpop.permute.xlu1 %698 }
 0x1bf   :  { %vm700_vm9 = vcmp.eq.s32.totalorder %v699_v14, %v1848_v44 }
 0x1c0   :  { %1494 = vset.pattern.permute.xlu1 %v1762_v18  ;;  %v1198_v34 = vsel %vm700_vm9, 1.0, %v1677_v47 }
 0x1c1   :  { %922 = vperm.xlu1 %1494, %v2022_v27   ;;  %v703_v37 = vadd.f32 %v1198_v34, %v696_v35  ;;  %v990_v35 = vld [vmem:[#allocation6 + $0x68] sm:$0xff] }
 0x1c2   :  { %1495 = vset.pattern.permute.xlu2 %v1763_v20 }
 0x1c3   :  { %929 = vperm.xlu2 %1495, %v2022_v27   ;;  %v755_v30 = vpop.permute.xlu2 %754  ;;  %v710_v42 = vadd.f32 %v1199_v39, %v703_v37  ;;  %v989_v37 = vld [vmem:[#allocation6 + $0x60] sm:$0xff] }
 0x1c4   :  { %vm756_vm1 = vcmp.eq.s32.totalorder %v755_v30, %v1848_v44  ;;  %v992_v30 = vld [vmem:[#allocation6 + $0x78] sm:$0xff] }
 0x1c5   :  { %v1206_v61 = vsel %vm756_vm1, 1.0, %v1677_v47  ;;  %993 = vmatpush.msra.mxu0 %v992_v30 }
 0x1c7   :  { %v713_v25 = vpop.permute.xlu1 %712  ;;  %994 = vmatpush.msra.mxu0 %v991_v3 }
 0x1c8   :  { %vm714_vm11 = vcmp.eq.s32.totalorder %v713_v25, %v1848_v44  ;;  %v832_v25 = vpop.permute.xlu0 %831 }
 0x1c9   :  { %1497 = vset.pattern.permute.xlu1 %v1764_v29  ;;  %v1200_v41 = vsel %vm714_vm11, 1.0, %v1677_v47  ;;  %vm833_vm12 = vcmp.eq.s32.totalorder %v832_v25, %v1848_v44  ;;  %995 = vmatpush.msra.mxu0 %v990_v35 }
 0x1ca   :  { %943 = vperm.xlu1 %1497, %v2022_v27   ;;  %v717_v45 = vadd.f32 %v1200_v41, %v710_v42 }
 0x1cb   :  { %1498 = vset.pattern.permute.xlu2 %v1765_v31  ;;  %v1217_v31 = vsel %vm833_vm12, 1.0, %v1677_v47  ;;  %996 = vmatpush.msra.mxu0 %v989_v37 }
 0x1cc   :  { %950 = vperm.xlu2 %1498, %v2022_v27   ;;  %v776_v40 = vpop.permute.xlu2 %775  ;;  %v724_v49 = vadd.f32 %v1201_v46, %v717_v45 }
 0x1cd   :  { %vm777_vm4 = vcmp.eq.s32.totalorder %v776_v40, %v1848_v44  ;;  %v988_v40 = vld [vmem:[#allocation6 + $0x58] sm:$0xff] }
 0x1ce   :  { %v1209_v6 = vsel %vm777_vm4, 1.0, %v1677_v47  ;;  %997 = vmatpush.msra.mxu0 %v988_v40 }
 0x1d0   :  { %v734_v36 = vpop.permute.xlu1 %733  ;;  %v867_v45 = vpop.permute.xlu0 %866  ;;  %998 = vmatpush.msra.mxu0 %v987_v43 }
 0x1d1   :  { %vm735_vm14 = vcmp.eq.s32.totalorder %v734_v36, %v1848_v44  ;;  %vm868_vm1 = vcmp.eq.s32.totalorder %v867_v45, %v1848_v44 }
 0x1d2   :  { %1499 = vset.pattern.permute.xlu1 %v1767_v38  ;;  %v1203_v52 = vsel %vm735_vm14, 1.0, %v1677_v47 }
 0x1d3   :  { %957 = vperm.xlu1 %1499, %v2022_v27  }
 0x1d4   :  { %1500 = vset.pattern.permute.xlu2 %v1766_v32 }
 0x1d5   :  { %964 = vperm.xlu2 %1500, %v2022_v27   ;;  %v790_v51 = vpop.permute.xlu2 %789  ;;  %v731_v27 = vadd.f32 %v1202_v50, %v724_v49  ;;  %v986_v49 = vld [vmem:[#allocation6 + $0x48] sm:$0xff] }
 0x1d6   :  { %vm791_vm6 = vcmp.eq.s32.totalorder %v790_v51, %v1848_v44  ;;  %999 = vmatpush.msra.mxu0 %v986_v49  ;;  %v1042_v49 = vld [vmem:[#allocation8 + $0x40] sm:$0xff] }
 0x1d7   :  { %v738_v53 = vadd.f32 %v1203_v52, %v731_v27  ;;  %v1211_v12 = vsel %vm791_vm6, 1.0, %v1677_v47  ;;  %v985_v52 = vld [vmem:[#allocation6 + $0x40] sm:$0xff] }
 0x1d8   :  { %1000 = vmatpush.msra.mxu0 %v985_v52  ;;  %v1039_v52 = vld [vmem:[#allocation8 + $0x28] sm:$0xff] }
 0x1d9   :  { %v748_v48 = vpop.permute.xlu1 %747  ;;  %v745_v57 = vadd.f32 %v1204_v55, %v738_v53  ;;  %v984_v53 = vld [vmem:[#allocation6 + $0x38] sm:$0xff]  ;;  %v983_v55 = vld [vmem:[#allocation6 + $0x30] sm:$0xff] }
 0x1da   :  { %vm749_vm0 = vcmp.eq.s32.totalorder %v748_v48, %v1848_v44  ;;  %1001 = vmatpush.msra.mxu0 %v984_v53  ;;  %v1035_v53 = vld [vmem:[#allocation8 + $0x8] sm:$0xff] }
 0x1db   :  { %v1205_v56 = vsel %vm749_vm0, 1.0, %v1677_v47 }
 0x1dc   :  { %v752_v60 = vadd.f32 %v1205_v56, %v745_v57  ;;  %1002 = vmatpush.msra.mxu0 %v983_v55 }
 0x1de   :  { %v811_v59 = vpop.permute.xlu2 %810  ;;  %v759_v63 = vadd.f32 %v1206_v61, %v752_v60  ;;  %1003 = vmatpush.msra.mxu0 %v982_v58  ;;  %v981_v60 = vld [vmem:[#allocation6 + $0x20] sm:$0xff] }
 0x1df   :  { %vm812_vm9 = vcmp.eq.s32.totalorder %v811_v59, %v1848_v44 }
 0x1e0   :  { %v766_v2 = vadd.f32 %v1207_v0, %v759_v63  ;;  %v1214_v20 = vsel %vm812_vm9, 1.0, %v1677_v47  ;;  %1004 = vmatpush.msra.mxu0 %v981_v60 }
 0x1e2   :  { %v769_v54 = vpop.permute.xlu1 %768 }
 0x1e3   :  { %vm770_vm3 = vcmp.eq.s32.totalorder %v769_v54, %v1848_v44  ;;  %v1222_v54 = vsel %vm868_vm1, 1.0, %v1677_v47 }
 0x1e4   :  { %v1208_v1 = vsel %vm770_vm3, 1.0, %v1677_v47 }
 0x1e5   :  { %v773_v5 = vadd.f32 %v1208_v1, %v766_v2 }
 0x1e7   :  { %v825_v4 = vpop.permute.xlu2 %824  ;;  %v780_v9 = vadd.f32 %v1209_v6, %v773_v5  ;;  %v902_v5 = vpop.permute.xlu0 %901 }
 0x1e8   :  { %vm826_vm11 = vcmp.eq.s32.totalorder %v825_v4, %v1848_v44  ;;  %v979_v4 = vld [vmem:[#allocation6 + $0x10] sm:$0xff]  ;;  %vm903_vm6 = vcmp.eq.s32.totalorder %v902_v5, %v1848_v44 }
 0x1e9   :  { %v1216_v28 = vsel %vm826_vm11, 1.0, %v1677_v47 }
 0x1eb   :  { %v783_v62 = vpop.permute.xlu1 %782 }
 0x1ec   :  { %vm784_vm5 = vcmp.eq.s32.totalorder %v783_v62, %v1848_v44  ;;  %v980_v62 = vld [vmem:[#allocation6 + $0x18] sm:$0xff] }
 0x1ed   :  { %v1210_v8 = vsel %vm784_vm5, 1.0, %v1677_v47  ;;  %1005 = vmatpush.msra.mxu0 %v980_v62 }
 0x1ee   :  { %v787_v11 = vadd.f32 %v1210_v8, %v780_v9  ;;  %v977_v8 = vld [vmem:[#allocation6] sm:$0xff] }
 0x1ef   :  { %1006 = vmatpush.msra.mxu0 %v979_v4 }
 0x1f0   :  { %v846_v13 = vpop.permute.xlu2 %845  ;;  %v794_v14 = vadd.f32 %v1211_v12, %v787_v11  ;;  %v1227_v12 = vsel %vm903_vm6, 1.0, %v1677_v47 }
 0x1f1   :  { %vm847_vm14 = vcmp.eq.s32.totalorder %v846_v13, %v1848_v44 }
 0x1f2   :  { %v801_v18 = vadd.f32 %v1212_v15, %v794_v14  ;;  %v1219_v39 = vsel %vm847_vm14, 1.0, %v1677_v47  ;;  %v1049_v14 = vld [vmem:[#allocation8 + $0x78] sm:$0xff]  ;;  %v1048_v15 = vld [vmem:[#allocation8 + $0x70] sm:$0xff] }
 0x1f3   :  { %1054 = vmatpush.msra.mxu1 %v1049_v14 }
 0x1f4   :  { %v804_v7 = vpop.permute.xlu1 %803 }
 0x1f5   :  { %vm805_vm8 = vcmp.eq.s32.totalorder %v804_v7, %v1848_v44  ;;  %v978_v7 = vld [vmem:[#allocation6 + $0x8] sm:$0xff]  ;;  %1055 = vmatpush.msra.mxu1 %v1048_v15 }
 0x1f6   :  { %v1213_v17 = vsel %vm805_vm8, 1.0, %v1677_v47  ;;  %1007 = vmatpush.msra.mxu0 %v978_v7 }
 0x1f7   :  { %v808_v19 = vadd.f32 %v1213_v17, %v801_v18  ;;  %v1047_v17 = vld [vmem:[#allocation8 + $0x68] sm:$0xff] }
 0x1f8   :  { %1008 = vmatpush.msra.mxu0 %v977_v8  ;;  %1056 = vmatpush.msra.mxu1 %v1047_v17 }
 0x1f9   :  { %v860_v22 = vpop.permute.xlu2 %859  ;;  %v815_v23 = vadd.f32 %v1214_v20, %v808_v19  ;;  %v1046_v19 = vld [vmem:[#allocation8 + $0x60] sm:$0xff] }
 0x1fa   :  { %vm861_vm0 = vcmp.eq.s32.totalorder %v860_v22, %v1848_v44  ;;  %1057 = vmatpush.msra.mxu1 %v1046_v19 }
 0x1fb   :  { %v1221_v50 = vsel %vm861_vm0, 1.0, %v1677_v47  ;;  %vm1013_vm0 = vcmp.gt.s32.totalorder %v1848_v44, 0 }
 0x1fd   :  { %v818_v16 = vpop.permute.xlu1 %817 }
 0x1fe   :  { %vm819_vm10 = vcmp.eq.s32.totalorder %v818_v16, %v1848_v44 }
 0x1ff   :  { %v1215_v21 = vsel %vm819_vm10, 1.0, %v1677_v47 }
 0x200   :  { %v822_v26 = vadd.f32 %v1215_v21, %v815_v23  ;;  %v1045_v23 = vld [vmem:[#allocation8 + $0x58] sm:$0xff] }
 0x201   :  { %1058 = vmatpush.msra.mxu1 %v1045_v23 }
 0x202   :  { %v829_v29 = vadd.f32 %v1216_v28, %v822_v26  ;;  %v881_v34 = vpop.permute.xlu2 %880  ;;  %v937_v26 = vpop.permute.xlu0 %936 }
 0x203   :  { %vm882_vm3 = vcmp.eq.s32.totalorder %v881_v34, %v1848_v44  ;;  %vm938_vm11 = vcmp.eq.s32.totalorder %v937_v26, %v1848_v44 }
 0x204   :  { %v836_v36 = vadd.f32 %v1217_v31, %v829_v29  ;;  %v1224_v63 = vsel %vm882_vm3, 1.0, %v1677_v47 }
 0x206   :  { %v839_v24 = vpop.permute.xlu1 %838 }
 0x207   :  { %vm840_vm13 = vcmp.eq.s32.totalorder %v839_v24, %v1848_v44 }
 0x208   :  { %v1218_v32 = vsel %vm840_vm13, 1.0, %v1677_v47 }
 0x209   :  { %v843_v38 = vadd.f32 %v1218_v32, %v836_v36  ;;  %v1232_v32 = vsel %vm938_vm11, 1.0, %v1677_v47 }
 0x20b   :  { %v850_v42 = vadd.f32 %v1219_v39, %v843_v38  ;;  %v895_v51 = vpop.permute.xlu2 %894 }
 0x20c   :  { %vm896_vm5 = vcmp.eq.s32.totalorder %v895_v51, %v1848_v44  ;;  %v1040_v51 = vld [vmem:[#allocation8 + $0x30] sm:$0xff] }
 0x20d   :  { %v1226_v9 = vsel %vm896_vm5, 1.0, %v1677_v47 }
 0x20f   :  { %v853_v33 = vpop.permute.xlu1 %852 }
 0x210   :  { %vm854_vm15 = vcmp.eq.s32.totalorder %v853_v33, %v1848_v44 }
 0x211   :  { %v1220_v41 = vsel %vm854_vm15, 1.0, %v1677_v47 }
 0x212   :  { %v857_v46 = vadd.f32 %v1220_v41, %v850_v42 }
 0x214   :  { %v864_v27 = vadd.f32 %v1221_v50, %v857_v46  ;;  %v916_v0 = vpop.permute.xlu2 %915  ;;  %v1044_v46 = vld [vmem:[#allocation8 + $0x50] sm:$0xff]  ;;  %v1041_v50 = vld [vmem:[#allocation8 + $0x38] sm:$0xff] }
 0x215   :  { %vm917_vm8 = vcmp.eq.s32.totalorder %v916_v0, %v1848_v44  ;;  %1059 = vmatpush.msra.mxu1 %v1044_v46 }
 0x216   :  { %v871_v57 = vadd.f32 %v1222_v54, %v864_v27  ;;  %v1229_v21 = vsel %vm917_vm8, 1.0, %v1677_v47  ;;  %v1037_v27 = vld [vmem:[#allocation8 + $0x18] sm:$0xff]  ;;  %v1034_v54 = vld [vmem:[#allocation8] sm:$0xff] }
 0x218   :  { %v874_v48 = vpop.permute.xlu1 %873 }
 0x219   :  { %vm875_vm2 = vcmp.eq.s32.totalorder %v874_v48, %v1848_v44  ;;  %v1043_v48 = vld [vmem:[#allocation8 + $0x48] sm:$0xff] }
 0x21a   :  { %v1223_v56 = vsel %vm875_vm2, 1.0, %v1677_v47  ;;  %1060 = vmatpush.msra.mxu1 %v1043_v48 }
 0x21b   :  { %v878_v61 = vadd.f32 %v1223_v56, %v871_v57 }
 0x21c   :  { %1061 = vmatpush.msra.mxu1 %v1042_v49 }
 0x21d   :  { %v885_v2 = vadd.f32 %v1224_v63, %v878_v61  ;;  %v930_v13 = vpop.permute.xlu2 %929 }
 0x21e   :  { %vm931_vm10 = vcmp.eq.s32.totalorder %v930_v13, %v1848_v44  ;;  %1062 = vmatpush.msra.mxu1 %v1041_v50 }
 0x21f   :  { %v1231_v30 = vsel %vm931_vm10, 1.0, %v1677_v47 }
 0x220   :  { %1063 = vmatpush.msra.mxu1 %v1040_v51 }
 0x221   :  { %v888_v59 = vpop.permute.xlu1 %887 }
 0x222   :  { %vm889_vm4 = vcmp.eq.s32.totalorder %v888_v59, %v1848_v44  ;;  %1064 = vmatpush.msra.mxu1 %v1039_v52 }
 0x223   :  { %v1225_v1 = vsel %vm889_vm4, 1.0, %v1677_v47 }
 0x224   :  { %v892_v6 = vadd.f32 %v1225_v1, %v885_v2 }
 0x226   :  { %v899_v11 = vadd.f32 %v1226_v9, %v892_v6  ;;  %v951_v28 = vpop.permute.xlu2 %950  ;;  %v1502_v6 = vld [vmem:[%s2236_s3] ss:$0 sm:$0xff] }
 0x227   :  { %vm952_vm13 = vcmp.eq.s32.totalorder %v951_v28, %v1848_v44 }
 0x228   :  { %v906_v18 = vadd.f32 %v1227_v12, %v899_v11  ;;  %v1234_v37 = vsel %vm952_vm13, 1.0, %v1677_v47 }
 0x22a   :  { %v909_v10 = vpop.permute.xlu1 %908 }
 0x22b   :  { %vm910_vm7 = vcmp.eq.s32.totalorder %v909_v10, %v1848_v44 }
 0x22c   :  { %v1228_v16 = vsel %vm910_vm7, 1.0, %v1677_v47 }
 0x22d   :  { %v913_v20 = vadd.f32 %v1228_v16, %v906_v18 }
 0x22f   :  { %v920_v25 = vadd.f32 %v1229_v21, %v913_v20  ;;  %v965_v35 = vpop.permute.xlu2 %964 }
 0x230   :  { %vm966_vm14 = vcmp.eq.s32.totalorder %v965_v35, %v1848_v44 }
 0x231   :  { %v1236_v41 = vsel %vm966_vm14, 1.0, %v1677_v47 }
 0x233   :  { %v923_v22 = vpop.permute.xlu1 %922 }
 0x234   :  { %vm924_vm9 = vcmp.eq.s32.totalorder %v923_v22, %v1848_v44 }
 0x235   :  { %v1230_v24 = vsel %vm924_vm9, 1.0, %v1677_v47 }
 0x236   :  { %v927_v29 = vadd.f32 %v1230_v24, %v920_v25 }
 0x238   :  { %v934_v31 = vadd.f32 %v1231_v30, %v927_v29 }
 0x23a   :  { %v941_v34 = vadd.f32 %v1232_v32, %v934_v31 }
 0x23c   :  { %v944_v3 = vpop.permute.xlu1 %943 }
 0x23d   :  { %vm945_vm12 = vcmp.eq.s32.totalorder %v944_v3, %v1848_v44 }
 0x23e   :  { %v1233_v33 = vsel %vm945_vm12, 1.0, %v1677_v47 }
 0x23f   :  { %v948_v36 = vadd.f32 %v1233_v33, %v941_v34 }
 0x241   :  { %v955_v39 = vadd.f32 %v1234_v37, %v948_v36 }
 0x245   :  { %v958_v38 = vpop.permute.xlu1 %957 }
 0x246   :  { %vm959_vm15 = vcmp.eq.s32.totalorder %v958_v38, %v1848_v44  ;;  %v1036_v44 = vld [vmem:[#allocation8 + $0x10] sm:$0xff] }
 0x247   :  { %v1235_v40 = vsel %vm959_vm15, 1.0, %v1677_v47  ;;  %v1038_v47 = vld [vmem:[#allocation8 + $0x20] sm:$0xff] }
 0x248   :  { %v962_v42 = vadd.f32 %v1235_v40, %v955_v39  ;;  %1065 = vmatpush.msra.mxu1 %v1038_v47 }
 0x24a   :  { %v969_v43 = vadd.f32 %v1236_v41, %v962_v42  ;;  %1066 = vmatpush.msra.mxu1 %v1037_v27 }
 0x24c   :  { %1009 = vmatmul.f32.vlgmr.msra.gmra.mxu0 %v969_v43  ;;  %v1014_v45 = vsel %vm1013_vm0, %v969_v43, 0.0  ;;  %1067 = vmatpush.msra.mxu1 %v1036_v44 }
 0x24d   :  { %1015 = vadd.xlane.f32.xlu0 %v1014_v45 }
 0x24e   :  { %1068 = vmatpush.msra.mxu1 %v1035_v53 }
 0x250   :  { %1069 = vmatpush.msra.mxu1 %v1034_v54 }
 0x2c0   :  { %v1016_v55 = vpop.xlane.xlu0 %1015 }
 0x2c1   :  { %v1017_v56 = vmax.f32 %v1016_v55, 1.0 }
 0x2c3   :  { %1503 = vrcp.f32 %v1017_v56  ;;  %v1029_v60 = vand.u32 2147483648, %v1017_v56  ;;  %v1027_v62 = vand.u32 2147483647, %v1017_v56  ;;  %vm1023_vm2 = vweird.f32 %v1017_v56 }
 0x2c5   :  { %v1030_v0 = vor.u32 1.1754944e-38, %v1029_v60  ;;  %vm1028_vm4 = vcmp.eq.f32.partialorder %v1027_v62, 8.507059e+37 }
 0x2c9   :  { %v1504_v57 = vpop.eup %1503  ;;  %v1010_v2 = vpop.f32.mrf.mxu0 }
 0x2ca   :  { %v1019_v58 = vmul.f32 %v1504_v57, %v1017_v56  ;;  %vm1024_vm1 = vweird.f32 %v1504_v57 }
 0x2cb   :  { %vm1025_vm3 = vmor %vm1023_vm2, %vm1024_vm1 }
 0x2cc   :  { %v1020_v59 = vsub.f32 1.0, %v1019_v58 }
 0x2ce   :  { %v1021_v61 = vmul.f32 %v1504_v57, %v1020_v59 }
 0x2d0   :  { %v1022_v63 = vadd.f32 %v1504_v57, %v1021_v61 }
 0x2d2   :  { %v1026_v1 = vsel %vm1025_vm3, %v1504_v57, %v1022_v63 }
 0x2d3   :  { %v1031_v4 = vsel %vm1028_vm4, %v1030_v0, %v1026_v1 }
 0x2d4   :  { %v1032_v5 = vmul.f32 %v1031_v4, %v1010_v2 }
 0x2d6   :  { %1033 = vst [vmem:[#allocation10] sm:$0xff] %v1032_v5  ;;  %1070 = vmatmul.f32.vlgmr.msra.gmra.mxu1 %v1032_v5 }
 0x2d7   :  { %1096 = dma.vmem_to_hbm [thread:$0]  %s1092_s2, 128, %s1094_s11, [#allocation11]  }
 0x353   :  { %v1071_v7 = vpop.f32.mrf.mxu1 }
 0x354   :  { %v1072_v8 = vadd.f32 %v1502_v6, %v1071_v7 }
 0x356   :  { %1074 = vst [vmem:[#allocation9] sm:$0xff] %v1072_v8 }
 0x357   :  { %1085 = dma.vmem_to_hbm [thread:$0]  %s1081_s15, 128, %s1083_s18, [#allocation5]  }
 0x358   :  { %1630 = dma.done.wait [#allocation5], 128  }
 0x359   :  { %1631 = vsyncadd [#allocation5], 4294967168 }
 0x35a   :  { %1632 = dma.done.wait [#allocation11], 128  }
 0x35b   :  { %1633 = vsyncadd [#allocation11], 4294967168 }
 0x35c   :  { %1105 = vsyncpa [#allocation4], 1 }
 0x35d   :  { %1106 = vsyncpa [#allocation7], 1 }
 0x35e   :  { %1107 = vsyncpa [#allocation5], 1 }
 0x35f   :  { %1108 = vsyncpa [#allocation11], 1 }

</bundles_post_ra>
